<compile_context>
chip_gen: v5e
topology: v5e:2x2
jax: 0.10.0
libtpu: 0.0.40
codegen_flags: <defaults>
</compile_context>

<pallas_src>
import functools
import math

import jax
import jax.numpy as jnp
import numpy as np
from jax.experimental import pallas as pl
from jax.experimental.pallas import tpu as pltpu

# < v7x's 64 MiB physical VMEM, above the 16/32 MiB scoped defaults.
_VMEM_LIMIT = 48 * 1024 * 1024


# ----------------------------------------------------------------------------
# in-kernel helpers (all f32 elementwise math)
# ----------------------------------------------------------------------------
def _erf(x):
    # Abramowitz & Stegun 7.1.26 (max abs err ~1.5e-7) -> float32-accurate.
    p = 0.3275911
    a1, a2, a3, a4, a5 = (0.254829592, -0.284496736, 1.421413741,
                          -1.453152027, 1.061405429)
    s = jnp.where(x >= 0.0, 1.0, -1.0)
    ax = jnp.abs(x)
    t = 1.0 / (1.0 + p * ax)
    poly = ((((a5 * t + a4) * t + a3) * t + a2) * t + a1) * t
    return s * (1.0 - poly * jnp.exp(-ax * ax))


def _gelu_exact(x):
    # matches torch.nn.GELU() (approximate='none')
    return 0.5 * x * (1.0 + _erf(x * 0.7071067811865476))


def _layernorm(x, gamma, beta, eps=1e-5):
    mu = jnp.mean(x, axis=-1, keepdims=True)
    var = jnp.mean((x - mu) ** 2, axis=-1, keepdims=True)
    return (x - mu) * jax.lax.rsqrt(var + eps) * gamma + beta


# ----------------------------------------------------------------------------
# kernel 1: fused-head recurrence + head mixing + FFN + proj  -> pr (rows, Dh)
# ----------------------------------------------------------------------------
def _core_kernel(x_ref, wab_ref, bab_ref, wc_ref, bc_ref, dwr_ref, dbr_ref,
                 mavg_ref, ssum_ref, hg_ref, hb_ref, ng_ref, nb_ref,
                 w1_ref, b1_ref, w2_ref, b2_ref, wp_ref, bp_ref,
                 pr_ref, *, H, Dh, L, Bt):
    f32 = jnp.float32
    bf16 = jnp.bfloat16
    HD = H * Dh

    x = x_ref[...]                                   # (L*Bt, E) f32
    xb = x.astype(bf16)

    # fused a/b projections for all heads at once (lane-dense N = 2*H*Dh)
    ab = jnp.dot(xb, wab_ref[...], preferred_element_type=f32) + bab_ref[...]
    a = jnp.tanh(ab[:, :HD])                         # (L*Bt, H*Dh)
    b = ab[:, HD:]                                   # (L*Bt, H*Dh)

    # D(x) replicated across heads (block layout matches a/b/hs columns)
    dx_rep = jnp.dot(xb, dwr_ref[...], preferred_element_type=f32) + dbr_ref[...]

    # parallel (Hillis-Steele) scan over time blocks of Bt rows:
    #   h_t = a_t * h_{t-1} + b_t, h_{-1} = 0  ->  result is `b` after scan.
    d = 1
    while d < L:
        sh = d * Bt
        a_prev = jnp.concatenate([jnp.ones((sh, HD), f32), a[:-sh]], axis=0)
        b_prev = jnp.concatenate([jnp.zeros((sh, HD), f32), b[:-sh]], axis=0)
        b = a * b_prev + b
        a = a * a_prev
        d *= 2
    hs = b                                           # (L*Bt, H*Dh)

    # per-head readout: block-diagonal C + bias + D(x), then per-head LN.
    y = (jnp.dot(hs.astype(bf16), wc_ref[...], preferred_element_type=f32)
         + bc_ref[...] + dx_rep)
    # per-head mean / variance via block-averaging matmul (stays lane-packed)
    mu = jnp.dot(y, mavg_ref[...], preferred_element_type=f32)
    dev = y - mu
    var = jnp.dot(dev * dev, mavg_ref[...], preferred_element_type=f32)
    # head_weights already folded into hg / hb
    heads = dev * jax.lax.rsqrt(var + 1e-5) * hg_ref[...] + hb_ref[...]

    dx = dx_rep[:, :Dh]                              # plain D(x)
    z = (dx + jnp.dot(heads, ssum_ref[...], preferred_element_type=f32)) * (1.0 / H)

    # trunk: residual LN + FFN + proj
    u = z + _layernorm(z, ng_ref[...], nb_ref[...])
    ff = _gelu_exact(
        jnp.dot(u.astype(bf16), w1_ref[...], preferred_element_type=f32) + b1_ref[...])
    o = jnp.dot(ff.astype(bf16), w2_ref[...], preferred_element_type=f32) + b2_ref[...]
    h_out = u + o
    pr_ref[...] = (
        jnp.dot(h_out.astype(bf16), wp_ref[...], preferred_element_type=f32)
        + bp_ref[...])


# ----------------------------------------------------------------------------
# kernel 2: output_fc as a (row-tile x vocab-tile) matmul, lane-dense stores
# ----------------------------------------------------------------------------
def _logits_kernel(pr_ref, wo_ref, bo_ref, out_ref):
    out_ref[...] = (
        jnp.dot(pr_ref[...].astype(jnp.bfloat16), wo_ref[...],
                preferred_element_type=jnp.float32) + bo_ref[...])


# ----------------------------------------------------------------------------
# wrapper-side parameter repacking (lane-dense, heads fused, hw folded into LN)
# ----------------------------------------------------------------------------
def _prep_params(params, H, Dh):
    E = params["Dw"].shape[0]
    HD = H * Dh
    bf16 = jnp.bfloat16

    wa = jnp.transpose(params["Wa"], (1, 0, 2)).reshape(E, HD)
    wb = jnp.transpose(params["Wb"], (1, 0, 2)).reshape(E, HD)
    wab = jnp.concatenate([wa, wb], axis=1)                       # (E, 2*HD)
    ba = jnp.transpose(params["ba"], (1, 0, 2)).reshape(1, HD)
    bb = jnp.transpose(params["bb"], (1, 0, 2)).reshape(1, HD)
    bab = jnp.concatenate([ba, bb], axis=1)                       # (1, 2*HD)

    wc_bd = jnp.zeros((HD, HD), jnp.float32)                      # block-diag C
    for i in range(H):
        wc_bd = wc_bd.at[i * Dh:(i + 1) * Dh, i * Dh:(i + 1) * Dh].set(
            params["Wc"][i])
    bc = jnp.transpose(params["bc"], (1, 0, 2)).reshape(1, HD)

    dwr = jnp.tile(params["Dw"], (1, H))                          # (E, HD)
    dbr = jnp.tile(params["Db"], (1, H))                          # (1, HD)

    # block-averaging matrix (per-head mean) and head-sum matrix
    mavg = jnp.kron(jnp.eye(H, dtype=jnp.float32),
                    jnp.full((Dh, Dh), 1.0 / Dh, jnp.float32))    # (HD, HD)
    ssum = jnp.tile(jnp.eye(Dh, dtype=jnp.float32), (H, 1))       # (HD, Dh)

    hw = params["hw"][:, None, None]
    hg = jnp.transpose(hw * params["hng"], (1, 0, 2)).reshape(1, HD)
    hb = jnp.transpose(hw * params["hnb"], (1, 0, 2)).reshape(1, HD)

    return dict(
        wab=wab.astype(bf16), bab=bab,
        wc=wc_bd.astype(bf16), bc=bc,
        dwr=dwr.astype(bf16), dbr=dbr,
        mavg=mavg, ssum=ssum, hg=hg, hb=hb,
        ng=params["ng"], nb=params["nb"],
        w1=params["W1"].astype(bf16), b1=params["b1"],
        w2=params["W2"].astype(bf16), b2=params["b2"],
        wp=params["Wp"].astype(bf16), bp=params["bp"],
    )


def _full_spec(shape):
    return pl.BlockSpec(shape, lambda g: (0,) * len(shape))


# ----------------------------------------------------------------------------
# forward wrapper
# ----------------------------------------------------------------------------
def mamba_plus_plus_forward(tokens, params, *, head_dim, num_heads):
    B, L = tokens.shape
    E = params["embed"].shape[1]
    V = params["Wo"].shape[1]
    Dh, H = head_dim, num_heads

    Bt = 8 if B % 8 == 0 else B            # batch tile (rows per timestep)
    nbt = B // Bt
    R = nbt * L * Bt
    assert (L * Bt) % 8 == 0, "L*Bt must be sublane-aligned"

    # glue: embedding gather + per-batch-tile time-major row layout
    emb = jnp.take(params["embed"], tokens, axis=0)               # (B, L, E)
    x = emb.reshape(nbt, Bt, L, E).transpose(0, 2, 1, 3).reshape(R, E)

    p = _prep_params(params, H, Dh)
    weights = [p["wab"], p["bab"], p["wc"], p["bc"], p["dwr"], p["dbr"],
               p["mavg"], p["ssum"], p["hg"], p["hb"], p["ng"], p["nb"],
               p["w1"], p["b1"], p["w2"], p["b2"], p["wp"], p["bp"]]

    # -------- kernel 1: grid over batch tiles (parallel; uses both TCs) -----
    kern1 = functools.partial(_core_kernel, H=H, Dh=Dh, L=L, Bt=Bt)
    pr = pl.pallas_call(
        kern1,
        out_shape=jax.ShapeDtypeStruct((R, Dh), jnp.float32),
        grid_spec=pltpu.PrefetchScalarGridSpec(
            num_scalar_prefetch=0,
            grid=(nbt,),
            in_specs=[pl.BlockSpec((L * Bt, E), lambda g: (g, 0))]
                     + [_full_spec(w.shape) for w in weights],
            out_specs=pl.BlockSpec((L * Bt, Dh), lambda g: (g, 0)),
        ),
        compiler_params=pltpu.CompilerParams(
            dimension_semantics=("parallel",),
            vmem_limit_bytes=_VMEM_LIMIT),
    )(x, *weights)

    # -------- kernel 2: output_fc tiled over (rows x 128-padded vocab) ------
    Vp = ((V + 127) // 128) * 128
    wo = jnp.pad(params["Wo"], ((0, 0), (0, Vp - V))).astype(jnp.bfloat16)
    bo = jnp.pad(params["bo"], ((0, 0), (0, Vp - V)))

    TR = L * Bt
    while TR * 2 <= min(R, 512) and R % (TR * 2) == 0:
        TR *= 2
    TV = 128
    while TV * 2 <= min(Vp, 512) and Vp % (TV * 2) == 0:
        TV *= 2

    logits_flat = pl.pallas_call(
        _logits_kernel,
        out_shape=jax.ShapeDtypeStruct((R, Vp), jnp.float32),
        grid_spec=pltpu.PrefetchScalarGridSpec(
            num_scalar_prefetch=0,
            grid=(R // TR, Vp // TV),
            in_specs=[pl.BlockSpec((TR, Dh), lambda i, j: (i, 0)),
                      pl.BlockSpec((Dh, TV), lambda i, j: (0, j)),
                      pl.BlockSpec((1, TV), lambda i, j: (0, j))],
            out_specs=pl.BlockSpec((TR, TV), lambda i, j: (i, j)),
        ),
        compiler_params=pltpu.CompilerParams(
            dimension_semantics=("parallel", "parallel"),
            vmem_limit_bytes=_VMEM_LIMIT),
    )(pr, wo, bo)

    logits = (logits_flat[:, :V]
              .reshape(nbt, L, Bt, V).transpose(0, 2, 1, 3).reshape(B, L, V))
    return logits


# ----------------------------------------------------------------------------
# deterministic parameter init (shapes follow the nn.Module __init__)
# ----------------------------------------------------------------------------
def init_params(key, vocab_size, embed_dim, head_dim, num_heads):
    E, Dh, H, V = embed_dim, head_dim, num_heads, vocab_size
    ks = jax.random.split(key, 20)

    def lin(k, fan_in, shape):
        bound = 1.0 / math.sqrt(fan_in)
        return jax.random.uniform(k, shape, jnp.float32, -bound, bound)

    embed = jax.random.normal(ks[0], (V, E), jnp.float32)
    embed = embed.at[0].set(0.0)   # padding_idx=0

    return dict(
        embed=embed,
        Wa=lin(ks[1], E, (H, E, Dh)),   ba=lin(ks[2], E, (H, 1, Dh)),
        Wb=lin(ks[3], E, (H, E, Dh)),   bb=lin(ks[4], E, (H, 1, Dh)),
        Wc=lin(ks[5], Dh, (H, Dh, Dh)), bc=lin(ks[6], Dh, (H, 1, Dh)),
        Dw=lin(ks[7], E, (E, Dh)),      Db=lin(ks[8], E, (1, Dh)),
        hw=jnp.ones((H,), jnp.float32),
        hng=jnp.ones((H, 1, Dh), jnp.float32),
        hnb=jnp.zeros((H, 1, Dh), jnp.float32),
        ng=jnp.ones((1, Dh), jnp.float32),
        nb=jnp.zeros((1, Dh), jnp.float32),
        W1=lin(ks[9], Dh, (Dh, 4 * Dh)),      b1=lin(ks[10], Dh, (1, 4 * Dh)),
        W2=lin(ks[11], 4 * Dh, (4 * Dh, Dh)), b2=lin(ks[12], 4 * Dh, (1, Dh)),
        Wp=lin(ks[13], Dh, (Dh, Dh)),         bp=lin(ks[14], Dh, (1, Dh)),
        Wo=lin(ks[15], Dh, (Dh, V)),          bo=lin(ks[16], Dh, (1, V)),
    )


# ----------------------------------------------------------------------------
# pure-JAX f32 reference (mirrors the PyTorch forward literally)
# ----------------------------------------------------------------------------
def reference_forward(tokens, params, *, head_dim, num_heads):
    emb = params["embed"][tokens]
    B, L, _ = emb.shape
    H, Dh = num_heads, head_dim

    def ln(x, g, b):
        mu = x.mean(-1, keepdims=True)
        var = ((x - mu) ** 2).mean(-1, keepdims=True)
        return (x - mu) / jnp.sqrt(var + 1e-5) * g + b

    h = [jnp.zeros((B, Dh), jnp.float32) for _ in range(H)]
    outs = []
    for t in range(L):
        xt = emb[:, t]
        Dx = xt @ params["Dw"] + params["Db"][0]
        s = Dx
        for i in range(H):
            a = jnp.tanh(xt @ params["Wa"][i] + params["ba"][i, 0])
            b = xt @ params["Wb"][i] + params["bb"][i, 0]
            h[i] = a * h[i] + b
            o = h[i] @ params["Wc"][i] + params["bc"][i, 0] + Dx
            o = ln(o, params["hng"][i, 0], params["hnb"][i, 0])
            s = s + params["hw"][i] * o
        outs.append(s / H)
    z = jnp.stack(outs, axis=1)
    u = z + ln(z, params["ng"][0], params["nb"][0])
    ff = jax.nn.gelu(u @ params["W1"] + params["b1"][0], approximate=False)
    o = ff @ params["W2"] + params["b2"][0]
    h_out = u + o
    pr = h_out @ params["Wp"] + params["bp"][0]
    return pr @ params["Wo"] + params["bo"][0]


if __name__ == "__main__":
    vocab_size, embed_dim, head_dim, num_heads = 32, 32, 16, 4
    B, L = 16, 8   # two batch tiles of 8 -> exercises the parallel grid axis

    key = jax.random.PRNGKey(0)
    pkey, xkey = jax.random.split(key)
    params = init_params(pkey, vocab_size, embed_dim, head_dim, num_heads)
    tokens = jax.random.randint(xkey, (B, L), 0, vocab_size, dtype=jnp.int32)

    logits = mamba_plus_plus_forward(
        tokens, params, head_dim=head_dim, num_heads=num_heads)
    jax.block_until_ready(logits)
    assert logits.shape == (B, L, vocab_size)

    ref = reference_forward(tokens, params, head_dim=head_dim, num_heads=num_heads)
    # bf16 MXU operands -> loosen tolerance vs the f32 reference (per review).
    np.testing.assert_allclose(np.asarray(logits), np.asarray(ref),
                               rtol=5e-2, atol=5e-2)

    print("KERNEL_OK")
</pallas_src>

<mosaic_0001>
module attributes {stable_mosaic.version = 11 : i64} {
  func.func @_core_kernel(%arg0: i32, %arg1: memref<64x32xf32, #tpu.memory_space<vmem>>, %arg2: memref<32x128xbf16, #tpu.memory_space<vmem>>, %arg3: memref<1x128xf32, #tpu.memory_space<vmem>>, %arg4: memref<64x64xbf16, #tpu.memory_space<vmem>>, %arg5: memref<1x64xf32, #tpu.memory_space<vmem>>, %arg6: memref<32x64xbf16, #tpu.memory_space<vmem>>, %arg7: memref<1x64xf32, #tpu.memory_space<vmem>>, %arg8: memref<64x64xf32, #tpu.memory_space<vmem>>, %arg9: memref<64x16xf32, #tpu.memory_space<vmem>>, %arg10: memref<1x64xf32, #tpu.memory_space<vmem>>, %arg11: memref<1x64xf32, #tpu.memory_space<vmem>>, %arg12: memref<1x16xf32, #tpu.memory_space<vmem>>, %arg13: memref<1x16xf32, #tpu.memory_space<vmem>>, %arg14: memref<16x64xbf16, #tpu.memory_space<vmem>>, %arg15: memref<1x64xf32, #tpu.memory_space<vmem>>, %arg16: memref<64x16xbf16, #tpu.memory_space<vmem>>, %arg17: memref<1x16xf32, #tpu.memory_space<vmem>>, %arg18: memref<16x16xbf16, #tpu.memory_space<vmem>>, %arg19: memref<1x16xf32, #tpu.memory_space<vmem>>, %arg20: memref<64x16xf32, #tpu.memory_space<vmem>>) attributes {dimension_semantics = [#tpu.dimension_semantics<parallel>], iteration_bounds = array<i64: 2>, scalar_prefetch = 0 : i64, scratch_operands = 0 : i64, tpu.core_type = #tpu.core_type<tc>, window_params = [{transform_indices = @transform_0, window_bounds = array<i64: 64, 32>}, {pipeline_mode = #tpu.pipeline_mode<synchronous>, transform_indices = @transform_1, window_bounds = array<i64: 32, 128>}, {pipeline_mode = #tpu.pipeline_mode<synchronous>, transform_indices = @transform_2, window_bounds = array<i64: 1, 128>}, {pipeline_mode = #tpu.pipeline_mode<synchronous>, transform_indices = @transform_3, window_bounds = array<i64: 64, 64>}, {pipeline_mode = #tpu.pipeline_mode<synchronous>, transform_indices = @transform_4, window_bounds = array<i64: 1, 64>}, {pipeline_mode = #tpu.pipeline_mode<synchronous>, transform_indices = @transform_5, window_bounds = array<i64: 32, 64>}, {pipeline_mode = #tpu.pipeline_mode<synchronous>, transform_indices = @transform_6, window_bounds = array<i64: 1, 64>}, {pipeline_mode = #tpu.pipeline_mode<synchronous>, transform_indices = @transform_7, window_bounds = array<i64: 64, 64>}, {pipeline_mode = #tpu.pipeline_mode<synchronous>, transform_indices = @transform_8, window_bounds = array<i64: 64, 16>}, {pipeline_mode = #tpu.pipeline_mode<synchronous>, transform_indices = @transform_9, window_bounds = array<i64: 1, 64>}, {pipeline_mode = #tpu.pipeline_mode<synchronous>, transform_indices = @transform_10, window_bounds = array<i64: 1, 64>}, {pipeline_mode = #tpu.pipeline_mode<synchronous>, transform_indices = @transform_11, window_bounds = array<i64: 1, 16>}, {pipeline_mode = #tpu.pipeline_mode<synchronous>, transform_indices = @transform_12, window_bounds = array<i64: 1, 16>}, {pipeline_mode = #tpu.pipeline_mode<synchronous>, transform_indices = @transform_13, window_bounds = array<i64: 16, 64>}, {pipeline_mode = #tpu.pipeline_mode<synchronous>, transform_indices = @transform_14, window_bounds = array<i64: 1, 64>}, {pipeline_mode = #tpu.pipeline_mode<synchronous>, transform_indices = @transform_15, window_bounds = array<i64: 64, 16>}, {pipeline_mode = #tpu.pipeline_mode<synchronous>, transform_indices = @transform_16, window_bounds = array<i64: 1, 16>}, {pipeline_mode = #tpu.pipeline_mode<synchronous>, transform_indices = @transform_17, window_bounds = array<i64: 16, 16>}, {pipeline_mode = #tpu.pipeline_mode<synchronous>, transform_indices = @transform_18, window_bounds = array<i64: 1, 16>}, {transform_indices = @transform_19, window_bounds = array<i64: 64, 16>}]} {
    %c0 = arith.constant 0 : index
    %c0_0 = arith.constant 0 : index
    %0 = vector.load %arg1[%c0, %c0_0] : memref<64x32xf32, #tpu.memory_space<vmem>>, vector<64x32xf32>
    %1 = arith.truncf %0 : vector<64x32xf32> to vector<64x32xbf16>
    %c0_1 = arith.constant 0 : index
    %c0_2 = arith.constant 0 : index
    %2 = vector.load %arg2[%c0_1, %c0_2] : memref<32x128xbf16, #tpu.memory_space<vmem>>, vector<32x128xbf16>
    %cst = arith.constant dense<0.000000e+00> : vector<64x128xf32>
    %3 = tpu.matmul %1, %2, %cst {dimension_numbers = #tpu.dot_dimension_numbers<[1], [0], [0], [1], [0, 0, 1, 1], [], []>} : vector<64x32xbf16>, vector<32x128xbf16>, vector<64x128xf32> -> vector<64x128xf32>
    %c0_3 = arith.constant 0 : index
    %c0_4 = arith.constant 0 : index
    %4 = vector.load %arg3[%c0_3, %c0_4] : memref<1x128xf32, #tpu.memory_space<vmem>>, vector<1x128xf32>
    %5 = vector.broadcast %4 : vector<1x128xf32> to vector<64x128xf32>
    %6 = arith.addf %3, %5 : vector<64x128xf32>
    %7 = vector.extract_strided_slice %6 {offsets = [0, 0], sizes = [64, 64], strides = [1, 1]} : vector<64x128xf32> to vector<64x64xf32>
    %8 = math.tanh %7 : vector<64x64xf32>
    %9 = vector.extract_strided_slice %6 {offsets = [0, 64], sizes = [64, 64], strides = [1, 1]} : vector<64x128xf32> to vector<64x64xf32>
    %c0_5 = arith.constant 0 : index
    %c0_6 = arith.constant 0 : index
    %10 = vector.load %arg6[%c0_5, %c0_6] : memref<32x64xbf16, #tpu.memory_space<vmem>>, vector<32x64xbf16>
    %cst_7 = arith.constant dense<0.000000e+00> : vector<64x64xf32>
    %11 = tpu.matmul %1, %10, %cst_7 {dimension_numbers = #tpu.dot_dimension_numbers<[1], [0], [0], [1], [0, 0, 1, 1], [], []>} : vector<64x32xbf16>, vector<32x64xbf16>, vector<64x64xf32> -> vector<64x64xf32>
    %c0_8 = arith.constant 0 : index
    %c0_9 = arith.constant 0 : index
    %12 = vector.load %arg7[%c0_8, %c0_9] : memref<1x64xf32, #tpu.memory_space<vmem>>, vector<1x64xf32>
    %13 = vector.broadcast %12 : vector<1x64xf32> to vector<64x64xf32>
    %14 = arith.addf %11, %13 : vector<64x64xf32>
    %cst_10 = arith.constant 1.000000e+00 : f32
    %15 = vector.broadcast %cst_10 : f32 to vector<8x64xf32>
    %16 = vector.extract_strided_slice %8 {offsets = [0, 0], sizes = [56, 64], strides = [1, 1]} : vector<64x64xf32> to vector<56x64xf32>
    %17 = tpu.concatenate %15, %16 in 0 : vector<8x64xf32>, vector<56x64xf32> -> vector<64x64xf32>
    %cst_11 = arith.constant 0.000000e+00 : f32
    %18 = vector.broadcast %cst_11 : f32 to vector<8x64xf32>
    %19 = vector.extract_strided_slice %9 {offsets = [0, 0], sizes = [56, 64], strides = [1, 1]} : vector<64x64xf32> to vector<56x64xf32>
    %20 = tpu.concatenate %18, %19 in 0 : vector<8x64xf32>, vector<56x64xf32> -> vector<64x64xf32>
    %21 = arith.mulf %8, %20 : vector<64x64xf32>
    %22 = arith.addf %21, %9 : vector<64x64xf32>
    %23 = arith.mulf %8, %17 : vector<64x64xf32>
    %cst_12 = arith.constant 1.000000e+00 : f32
    %24 = vector.broadcast %cst_12 : f32 to vector<16x64xf32>
    %25 = vector.extract_strided_slice %23 {offsets = [0, 0], sizes = [48, 64], strides = [1, 1]} : vector<64x64xf32> to vector<48x64xf32>
    %26 = tpu.concatenate %24, %25 in 0 : vector<16x64xf32>, vector<48x64xf32> -> vector<64x64xf32>
    %cst_13 = arith.constant 0.000000e+00 : f32
    %27 = vector.broadcast %cst_13 : f32 to vector<16x64xf32>
    %28 = vector.extract_strided_slice %22 {offsets = [0, 0], sizes = [48, 64], strides = [1, 1]} : vector<64x64xf32> to vector<48x64xf32>
    %29 = tpu.concatenate %27, %28 in 0 : vector<16x64xf32>, vector<48x64xf32> -> vector<64x64xf32>
    %30 = arith.mulf %23, %29 : vector<64x64xf32>
    %31 = arith.addf %30, %22 : vector<64x64xf32>
    %32 = arith.mulf %23, %26 : vector<64x64xf32>
    %cst_14 = arith.constant 0.000000e+00 : f32
    %33 = vector.broadcast %cst_14 : f32 to vector<32x64xf32>
    %34 = vector.extract_strided_slice %31 {offsets = [0, 0], sizes = [32, 64], strides = [1, 1]} : vector<64x64xf32> to vector<32x64xf32>
    %35 = tpu.concatenate %33, %34 in 0 : vector<32x64xf32>, vector<32x64xf32> -> vector<64x64xf32>
    %36 = arith.mulf %32, %35 : vector<64x64xf32>
    %37 = arith.addf %36, %31 : vector<64x64xf32>
    %38 = arith.truncf %37 : vector<64x64xf32> to vector<64x64xbf16>
    %c0_15 = arith.constant 0 : index
    %c0_16 = arith.constant 0 : index
    %39 = vector.load %arg4[%c0_15, %c0_16] : memref<64x64xbf16, #tpu.memory_space<vmem>>, vector<64x64xbf16>
    %cst_17 = arith.constant dense<0.000000e+00> : vector<64x64xf32>
    %40 = tpu.matmul %38, %39, %cst_17 {dimension_numbers = #tpu.dot_dimension_numbers<[1], [0], [0], [1], [0, 0, 1, 1], [], []>} : vector<64x64xbf16>, vector<64x64xbf16>, vector<64x64xf32> -> vector<64x64xf32>
    %c0_18 = arith.constant 0 : index
    %c0_19 = arith.constant 0 : index
    %41 = vector.load %arg5[%c0_18, %c0_19] : memref<1x64xf32, #tpu.memory_space<vmem>>, vector<1x64xf32>
    %42 = vector.broadcast %41 : vector<1x64xf32> to vector<64x64xf32>
    %43 = arith.addf %40, %42 : vector<64x64xf32>
    %44 = arith.addf %43, %14 : vector<64x64xf32>
    %c0_20 = arith.constant 0 : index
    %c0_21 = arith.constant 0 : index
    %45 = vector.load %arg8[%c0_20, %c0_21] : memref<64x64xf32, #tpu.memory_space<vmem>>, vector<64x64xf32>
    %cst_22 = arith.constant dense<0.000000e+00> : vector<64x64xf32>
    %46 = tpu.matmul %44, %45, %cst_22 {dimension_numbers = #tpu.dot_dimension_numbers<[1], [0], [0], [1], [0, 0, 1, 1], [], []>} : vector<64x64xf32>, vector<64x64xf32>, vector<64x64xf32> -> vector<64x64xf32>
    %47 = arith.subf %44, %46 : vector<64x64xf32>
    %48 = arith.mulf %47, %47 : vector<64x64xf32>
    %c0_23 = arith.constant 0 : index
    %c0_24 = arith.constant 0 : index
    %49 = vector.load %arg8[%c0_23, %c0_24] : memref<64x64xf32, #tpu.memory_space<vmem>>, vector<64x64xf32>
    %cst_25 = arith.constant dense<0.000000e+00> : vector<64x64xf32>
    %50 = tpu.matmul %48, %49, %cst_25 {dimension_numbers = #tpu.dot_dimension_numbers<[1], [0], [0], [1], [0, 0, 1, 1], [], []>} : vector<64x64xf32>, vector<64x64xf32>, vector<64x64xf32> -> vector<64x64xf32>
    %cst_26 = arith.constant 9.99999974E-6 : f32
    %51 = vector.broadcast %cst_26 : f32 to vector<64x64xf32>
    %52 = arith.addf %50, %51 : vector<64x64xf32>
    %53 = math.rsqrt %52 : vector<64x64xf32>
    %54 = arith.mulf %47, %53 : vector<64x64xf32>
    %c0_27 = arith.constant 0 : index
    %c0_28 = arith.constant 0 : index
    %55 = vector.load %arg10[%c0_27, %c0_28] : memref<1x64xf32, #tpu.memory_space<vmem>>, vector<1x64xf32>
    %56 = vector.broadcast %55 : vector<1x64xf32> to vector<64x64xf32>
    %57 = arith.mulf %54, %56 : vector<64x64xf32>
    %c0_29 = arith.constant 0 : index
    %c0_30 = arith.constant 0 : index
    %58 = vector.load %arg11[%c0_29, %c0_30] : memref<1x64xf32, #tpu.memory_space<vmem>>, vector<1x64xf32>
    %59 = vector.broadcast %58 : vector<1x64xf32> to vector<64x64xf32>
    %60 = arith.addf %57, %59 : vector<64x64xf32>
    %61 = vector.extract_strided_slice %14 {offsets = [0, 0], sizes = [64, 16], strides = [1, 1]} : vector<64x64xf32> to vector<64x16xf32>
    %c0_31 = arith.constant 0 : index
    %c0_32 = arith.constant 0 : index
    %62 = vector.load %arg9[%c0_31, %c0_32] : memref<64x16xf32, #tpu.memory_space<vmem>>, vector<64x16xf32>
    %cst_33 = arith.constant dense<0.000000e+00> : vector<64x16xf32>
    %63 = tpu.matmul %60, %62, %cst_33 {dimension_numbers = #tpu.dot_dimension_numbers<[1], [0], [0], [1], [0, 0, 1, 1], [], []>} : vector<64x64xf32>, vector<64x16xf32>, vector<64x16xf32> -> vector<64x16xf32>
    %64 = arith.addf %61, %63 : vector<64x16xf32>
    %cst_34 = arith.constant 2.500000e-01 : f32
    %65 = vector.broadcast %cst_34 : f32 to vector<64x16xf32>
    %66 = arith.mulf %64, %65 : vector<64x16xf32>
    %c0_35 = arith.constant 0 : index
    %c0_36 = arith.constant 0 : index
    %67 = vector.load %arg12[%c0_35, %c0_36] : memref<1x16xf32, #tpu.memory_space<vmem>>, vector<1x16xf32>
    %c0_37 = arith.constant 0 : index
    %c0_38 = arith.constant 0 : index
    %68 = vector.load %arg13[%c0_37, %c0_38] : memref<1x16xf32, #tpu.memory_space<vmem>>, vector<1x16xf32>
    %cst_39 = arith.constant dense<0.000000e+00> : vector<64xf32>
    %69 = vector.multi_reduction <add>, %66, %cst_39 [1] : vector<64x16xf32> to vector<64xf32>
    %70 = vector.shape_cast %69 : vector<64xf32> to vector<64x1xf32>
    %cst_40 = arith.constant 1.600000e+01 : f32
    %71 = vector.broadcast %cst_40 : f32 to vector<64x1xf32>
    %72 = arith.divf %70, %71 : vector<64x1xf32>
    %73 = vector.broadcast %72 : vector<64x1xf32> to vector<64x16xf32>
    %74 = arith.subf %66, %73 : vector<64x16xf32>
    %75 = arith.mulf %74, %74 : vector<64x16xf32>
    %cst_41 = arith.constant dense<0.000000e+00> : vector<64xf32>
    %76 = vector.multi_reduction <add>, %75, %cst_41 [1] : vector<64x16xf32> to vector<64xf32>
    %77 = vector.shape_cast %76 : vector<64xf32> to vector<64x1xf32>
    %cst_42 = arith.constant 1.600000e+01 : f32
    %78 = vector.broadcast %cst_42 : f32 to vector<64x1xf32>
    %79 = arith.divf %77, %78 : vector<64x1xf32>
    %80 = vector.broadcast %72 : vector<64x1xf32> to vector<64x16xf32>
    %81 = arith.subf %66, %80 : vector<64x16xf32>
    %cst_43 = arith.constant 9.99999974E-6 : f32
    %82 = vector.broadcast %cst_43 : f32 to vector<64x1xf32>
    %83 = arith.addf %79, %82 : vector<64x1xf32>
    %84 = math.rsqrt %83 : vector<64x1xf32>
    %85 = vector.broadcast %84 : vector<64x1xf32> to vector<64x16xf32>
    %86 = arith.mulf %81, %85 : vector<64x16xf32>
    %87 = vector.broadcast %67 : vector<1x16xf32> to vector<64x16xf32>
    %88 = arith.mulf %86, %87 : vector<64x16xf32>
    %89 = vector.broadcast %68 : vector<1x16xf32> to vector<64x16xf32>
    %90 = arith.addf %88, %89 : vector<64x16xf32>
    %91 = arith.addf %66, %90 : vector<64x16xf32>
    %92 = arith.truncf %91 : vector<64x16xf32> to vector<64x16xbf16>
    %c0_44 = arith.constant 0 : index
    %c0_45 = arith.constant 0 : index
    %93 = vector.load %arg14[%c0_44, %c0_45] : memref<16x64xbf16, #tpu.memory_space<vmem>>, vector<16x64xbf16>
    %cst_46 = arith.constant dense<0.000000e+00> : vector<64x64xf32>
    %94 = tpu.matmul %92, %93, %cst_46 {dimension_numbers = #tpu.dot_dimension_numbers<[1], [0], [0], [1], [0, 0, 1, 1], [], []>} : vector<64x16xbf16>, vector<16x64xbf16>, vector<64x64xf32> -> vector<64x64xf32>
    %c0_47 = arith.constant 0 : index
    %c0_48 = arith.constant 0 : index
    %95 = vector.load %arg15[%c0_47, %c0_48] : memref<1x64xf32, #tpu.memory_space<vmem>>, vector<1x64xf32>
    %96 = vector.broadcast %95 : vector<1x64xf32> to vector<64x64xf32>
    %97 = arith.addf %94, %96 : vector<64x64xf32>
    %cst_49 = arith.constant 5.000000e-01 : f32
    %98 = vector.broadcast %cst_49 : f32 to vector<64x64xf32>
    %99 = arith.mulf %98, %97 : vector<64x64xf32>
    %cst_50 = arith.constant 0.707106769 : f32
    %100 = vector.broadcast %cst_50 : f32 to vector<64x64xf32>
    %101 = arith.mulf %97, %100 : vector<64x64xf32>
    %cst_51 = arith.constant 0.000000e+00 : f32
    %102 = vector.broadcast %cst_51 : f32 to vector<64x64xf32>
    %103 = arith.cmpf oge, %101, %102 : vector<64x64xf32>
    %cst_52 = arith.constant 1.000000e+00 : f32
    %cst_53 = arith.constant -1.000000e+00 : f32
    %104 = vector.broadcast %cst_52 : f32 to vector<64x64xf32>
    %105 = vector.broadcast %cst_53 : f32 to vector<64x64xf32>
    %106 = arith.select %103, %104, %105 : vector<64x64xi1>, vector<64x64xf32>
    %107 = math.absf %101 : vector<64x64xf32>
    %cst_54 = arith.constant 0.327591091 : f32
    %108 = vector.broadcast %cst_54 : f32 to vector<64x64xf32>
    %109 = arith.mulf %108, %107 : vector<64x64xf32>
    %cst_55 = arith.constant 1.000000e+00 : f32
    %110 = vector.broadcast %cst_55 : f32 to vector<64x64xf32>
    %111 = arith.addf %110, %109 : vector<64x64xf32>
    %cst_56 = arith.constant 1.000000e+00 : f32
    %112 = vector.broadcast %cst_56 : f32 to vector<64x64xf32>
    %113 = arith.divf %112, %111 : vector<64x64xf32>
    %cst_57 = arith.constant 1.06140542 : f32
    %114 = vector.broadcast %cst_57 : f32 to vector<64x64xf32>
    %115 = arith.mulf %114, %113 : vector<64x64xf32>
    %cst_58 = arith.constant -1.45315206 : f32
    %116 = vector.broadcast %cst_58 : f32 to vector<64x64xf32>
    %117 = arith.addf %115, %116 : vector<64x64xf32>
    %118 = arith.mulf %117, %113 : vector<64x64xf32>
    %cst_59 = arith.constant 1.42141378 : f32
    %119 = vector.broadcast %cst_59 : f32 to vector<64x64xf32>
    %120 = arith.addf %118, %119 : vector<64x64xf32>
    %121 = arith.mulf %120, %113 : vector<64x64xf32>
    %cst_60 = arith.constant -0.284496725 : f32
    %122 = vector.broadcast %cst_60 : f32 to vector<64x64xf32>
    %123 = arith.addf %121, %122 : vector<64x64xf32>
    %124 = arith.mulf %123, %113 : vector<64x64xf32>
    %cst_61 = arith.constant 0.254829586 : f32
    %125 = vector.broadcast %cst_61 : f32 to vector<64x64xf32>
    %126 = arith.addf %124, %125 : vector<64x64xf32>
    %127 = arith.mulf %126, %113 : vector<64x64xf32>
    %cst_62 = arith.constant 0.000000e+00 : f32
    %128 = vector.broadcast %cst_62 : f32 to vector<64x64xf32>
    %129 = arith.subf %128, %107 : vector<64x64xf32>
    %130 = arith.mulf %129, %107 : vector<64x64xf32>
    %131 = math.exp %130 : vector<64x64xf32>
    %132 = arith.mulf %127, %131 : vector<64x64xf32>
    %cst_63 = arith.constant 1.000000e+00 : f32
    %133 = vector.broadcast %cst_63 : f32 to vector<64x64xf32>
    %134 = arith.subf %133, %132 : vector<64x64xf32>
    %135 = arith.mulf %106, %134 : vector<64x64xf32>
    %cst_64 = arith.constant 1.000000e+00 : f32
    %136 = vector.broadcast %cst_64 : f32 to vector<64x64xf32>
    %137 = arith.addf %136, %135 : vector<64x64xf32>
    %138 = arith.mulf %99, %137 : vector<64x64xf32>
    %139 = arith.truncf %138 : vector<64x64xf32> to vector<64x64xbf16>
    %c0_65 = arith.constant 0 : index
    %c0_66 = arith.constant 0 : index
    %140 = vector.load %arg16[%c0_65, %c0_66] : memref<64x16xbf16, #tpu.memory_space<vmem>>, vector<64x16xbf16>
    %cst_67 = arith.constant dense<0.000000e+00> : vector<64x16xf32>
    %141 = tpu.matmul %139, %140, %cst_67 {dimension_numbers = #tpu.dot_dimension_numbers<[1], [0], [0], [1], [0, 0, 1, 1], [], []>} : vector<64x64xbf16>, vector<64x16xbf16>, vector<64x16xf32> -> vector<64x16xf32>
    %c0_68 = arith.constant 0 : index
    %c0_69 = arith.constant 0 : index
    %142 = vector.load %arg17[%c0_68, %c0_69] : memref<1x16xf32, #tpu.memory_space<vmem>>, vector<1x16xf32>
    %143 = vector.broadcast %142 : vector<1x16xf32> to vector<64x16xf32>
    %144 = arith.addf %141, %143 : vector<64x16xf32>
    %145 = arith.addf %91, %144 : vector<64x16xf32>
    %146 = arith.truncf %145 : vector<64x16xf32> to vector<64x16xbf16>
    %c0_70 = arith.constant 0 : index
    %c0_71 = arith.constant 0 : index
    %147 = vector.load %arg18[%c0_70, %c0_71] : memref<16x16xbf16, #tpu.memory_space<vmem>>, vector<16x16xbf16>
    %cst_72 = arith.constant dense<0.000000e+00> : vector<64x16xf32>
    %148 = tpu.matmul %146, %147, %cst_72 {dimension_numbers = #tpu.dot_dimension_numbers<[1], [0], [0], [1], [0, 0, 1, 1], [], []>} : vector<64x16xbf16>, vector<16x16xbf16>, vector<64x16xf32> -> vector<64x16xf32>
    %c0_73 = arith.constant 0 : index
    %c0_74 = arith.constant 0 : index
    %149 = vector.load %arg19[%c0_73, %c0_74] : memref<1x16xf32, #tpu.memory_space<vmem>>, vector<1x16xf32>
    %150 = vector.broadcast %149 : vector<1x16xf32> to vector<64x16xf32>
    %151 = arith.addf %148, %150 : vector<64x16xf32>
    %c0_75 = arith.constant 0 : index
    %c0_76 = arith.constant 0 : index
    %152 = vector.load %arg20[%c0_75, %c0_76] : memref<64x16xf32, #tpu.memory_space<vmem>>, vector<64x16xf32>
    tpu.vector_store %arg20[%c0_75, %c0_76], %151 {strides = array<i32>} : memref<64x16xf32, #tpu.memory_space<vmem>>, vector<64x16xf32>,
    return
  }
  func.func @transform_0(%arg0: i32) -> (i32, i32) {
    %c0_i32 = arith.constant 0 : i32
    %c0_i32_0 = arith.constant 0 : i32
    return %arg0, %c0_i32 : i32, i32
  }
  func.func @transform_1(%arg0: i32) -> (i32, i32) {
    %c0_i32 = arith.constant 0 : i32
    %c0_i32_0 = arith.constant 0 : i32
    %c0_i32_1 = arith.constant 0 : i32
    return %c0_i32, %c0_i32_0 : i32, i32
  }
  func.func @transform_2(%arg0: i32) -> (i32, i32) {
    %c0_i32 = arith.constant 0 : i32
    %c0_i32_0 = arith.constant 0 : i32
    %c0_i32_1 = arith.constant 0 : i32
    return %c0_i32, %c0_i32_0 : i32, i32
  }
  func.func @transform_3(%arg0: i32) -> (i32, i32) {
    %c0_i32 = arith.constant 0 : i32
    %c0_i32_0 = arith.constant 0 : i32
    %c0_i32_1 = arith.constant 0 : i32
    return %c0_i32, %c0_i32_0 : i32, i32
  }
  func.func @transform_4(%arg0: i32) -> (i32, i32) {
    %c0_i32 = arith.constant 0 : i32
    %c0_i32_0 = arith.constant 0 : i32
    %c0_i32_1 = arith.constant 0 : i32
    return %c0_i32, %c0_i32_0 : i32, i32
  }
  func.func @transform_5(%arg0: i32) -> (i32, i32) {
    %c0_i32 = arith.constant 0 : i32
    %c0_i32_0 = arith.constant 0 : i32
    %c0_i32_1 = arith.constant 0 : i32
    return %c0_i32, %c0_i32_0 : i32, i32
  }
  func.func @transform_6(%arg0: i32) -> (i32, i32) {
    %c0_i32 = arith.constant 0 : i32
    %c0_i32_0 = arith.constant 0 : i32
    %c0_i32_1 = arith.constant 0 : i32
    return %c0_i32, %c0_i32_0 : i32, i32
  }
  func.func @transform_7(%arg0: i32) -> (i32, i32) {
    %c0_i32 = arith.constant 0 : i32
    %c0_i32_0 = arith.constant 0 : i32
    %c0_i32_1 = arith.constant 0 : i32
    return %c0_i32, %c0_i32_0 : i32, i32
  }
  func.func @transform_8(%arg0: i32) -> (i32, i32) {
    %c0_i32 = arith.constant 0 : i32
    %c0_i32_0 = arith.constant 0 : i32
    %c0_i32_1 = arith.constant 0 : i32
    return %c0_i32, %c0_i32_0 : i32, i32
  }
  func.func @transform_9(%arg0: i32) -> (i32, i32) {
    %c0_i32 = arith.constant 0 : i32
    %c0_i32_0 = arith.constant 0 : i32
    %c0_i32_1 = arith.constant 0 : i32
    return %c0_i32, %c0_i32_0 : i32, i32
  }
  func.func @transform_10(%arg0: i32) -> (i32, i32) {
    %c0_i32 = arith.constant 0 : i32
    %c0_i32_0 = arith.constant 0 : i32
    %c0_i32_1 = arith.constant 0 : i32
    return %c0_i32, %c0_i32_0 : i32, i32
  }
  func.func @transform_11(%arg0: i32) -> (i32, i32) {
    %c0_i32 = arith.constant 0 : i32
    %c0_i32_0 = arith.constant 0 : i32
    %c0_i32_1 = arith.constant 0 : i32
    return %c0_i32, %c0_i32_0 : i32, i32
  }
  func.func @transform_12(%arg0: i32) -> (i32, i32) {
    %c0_i32 = arith.constant 0 : i32
    %c0_i32_0 = arith.constant 0 : i32
    %c0_i32_1 = arith.constant 0 : i32
    return %c0_i32, %c0_i32_0 : i32, i32
  }
  func.func @transform_13(%arg0: i32) -> (i32, i32) {
    %c0_i32 = arith.constant 0 : i32
    %c0_i32_0 = arith.constant 0 : i32
    %c0_i32_1 = arith.constant 0 : i32
    return %c0_i32, %c0_i32_0 : i32, i32
  }
  func.func @transform_14(%arg0: i32) -> (i32, i32) {
    %c0_i32 = arith.constant 0 : i32
    %c0_i32_0 = arith.constant 0 : i32
    %c0_i32_1 = arith.constant 0 : i32
    return %c0_i32, %c0_i32_0 : i32, i32
  }
  func.func @transform_15(%arg0: i32) -> (i32, i32) {
    %c0_i32 = arith.constant 0 : i32
    %c0_i32_0 = arith.constant 0 : i32
    %c0_i32_1 = arith.constant 0 : i32
    return %c0_i32, %c0_i32_0 : i32, i32
  }
  func.func @transform_16(%arg0: i32) -> (i32, i32) {
    %c0_i32 = arith.constant 0 : i32
    %c0_i32_0 = arith.constant 0 : i32
    %c0_i32_1 = arith.constant 0 : i32
    return %c0_i32, %c0_i32_0 : i32, i32
  }
  func.func @transform_17(%arg0: i32) -> (i32, i32) {
    %c0_i32 = arith.constant 0 : i32
    %c0_i32_0 = arith.constant 0 : i32
    %c0_i32_1 = arith.constant 0 : i32
    return %c0_i32, %c0_i32_0 : i32, i32
  }
  func.func @transform_18(%arg0: i32) -> (i32, i32) {
    %c0_i32 = arith.constant 0 : i32
    %c0_i32_0 = arith.constant 0 : i32
    %c0_i32_1 = arith.constant 0 : i32
    return %c0_i32, %c0_i32_0 : i32, i32
  }
  func.func @transform_19(%arg0: i32) -> (i32, i32) {
    %c0_i32 = arith.constant 0 : i32
    %c0_i32_0 = arith.constant 0 : i32
    return %arg0, %c0_i32 : i32, i32
  }
}

</mosaic_0001>

<bundles_post_ra>
// kernel: tpu_custom_call.1
= control target key start
LH: loop header
LB: loop body
LE: loop exit
PB: predicated region body
PF: predicated region fallthrough
CT: control target
= control target key end

     0   :  { %s3061_s0 = inlined_call_operand.vmem [shape: f32[128,32], index: 0, kind: input, shape index: {}]   ;;  %s3062_s1 = inlined_call_operand.vmem [shape: bf16[32,128], index: 1, kind: input, shape index: {}]   ;;  %s3063_s2 = inlined_call_operand.vmem [shape: f32[1,128], index: 2, kind: input, shape index: {}]   ;;  %s3064_s3 = inlined_call_operand.vmem [shape: bf16[64,64], index: 3, kind: input, shape index: {}]   ;;  %s3065_s4 = inlined_call_operand.vmem [shape: f32[1,64], index: 4, kind: input, shape index: {}]   ;;  %s3066_s5 = inlined_call_operand.vmem [shape: bf16[32,64], index: 5, kind: input, shape index: {}]   ;;  %s3067_s6 = inlined_call_operand.vmem [shape: f32[1,64], index: 6, kind: input, shape index: {}]   ;;  %s3068_s7 = inlined_call_operand.vmem [shape: f32[64,64], index: 7, kind: input, shape index: {}]   ;;  %s3069_s8 = inlined_call_operand.vmem [shape: f32[64,16], index: 8, kind: input, shape index: {}]   ;;  %s3070_s9 = inlined_call_operand.vmem [shape: f32[1,64], index: 9, kind: input, shape index: {}]   ;;  %s3071_s10 = inlined_call_operand.vmem [shape: f32[1,64], index: 10, kind: input, shape index: {}]   ;;  %s3072_s11 = inlined_call_operand.vmem [shape: f32[1,16], index: 11, kind: input, shape index: {}]   ;;  %s3073_s12 = inlined_call_operand.vmem [shape: f32[1,16], index: 12, kind: input, shape index: {}]   ;;  %s3074_s13 = inlined_call_operand.vmem [shape: bf16[16,64], index: 13, kind: input, shape index: {}]   ;;  %s3075_s14 = inlined_call_operand.vmem [shape: f32[1,64], index: 14, kind: input, shape index: {}]   ;;  %s3076_s15 = inlined_call_operand.vmem [shape: bf16[64,16], index: 15, kind: input, shape index: {}]   ;;  %s3077_s16 = inlined_call_operand.vmem [shape: f32[1,16], index: 16, kind: input, shape index: {}]   ;;  %s3078_s17 = inlined_call_operand.vmem [shape: bf16[16,16], index: 17, kind: input, shape index: {}]   ;;  %s3079_s18 = inlined_call_operand.vmem [shape: f32[1,16], index: 18, kind: input, shape index: {}]   ;;  %s3080_s19 = inlined_call_operand.vmem [shape: f32[128,16], index: 19, kind: output, shape index: {}]  }
   0x1   :  { %3083 = sst [smem:[#allocation2_spill]] %s3061_s0  ;;  %s2425_s0 = smov 0  }
   0x2   :  { %3084 = sst [smem:[#allocation3_spill]] %s3062_s1 }
   0x3   :  { %3085 = sst [smem:[#allocation4_spill]] %s3063_s2 }
   0x4   :  { %3086 = sst [smem:[#allocation5_spill]] %s3064_s3 }
   0x5 LB: > { %s2076_s30 = sadd.s32 4294967295, %s2320_s0   ;;  %p2080_p0 = scmp.ge.s32.totalorder %s2320_s0, 1  ;;  %s2320_s0 = sphi %s2425_s0, %s29_s0  }
   0x6   : > { %p538_p1 = scmp.lt.s32.totalorder %s2320_s0, 3 }
   0x8   : > { %p539_p2 = pnand %p2080_p0, %p538_p1 }
   0x9   : > { %s3087_s1 = sld [smem:[#allocation3_spill]] (!%p539_p2)  ;;  %s2081_s22 = sshll.u32 (!%p539_p2), %s2076_s30, 3 }
   0xa   : > { %542 = sbr.rel (%p539_p2) target bundleno = 1720 (0x6b8), region = 96  ;;  %p595_p3 = scmp.lt.s32.totalorder (!%p539_p2), %s2081_s22, 15 }
   0xb   : > { %s3088_s26 = sld [smem:[#allocation2_spill]] (!%p539_p2)  ;;  %s2322_s20 = smov (!%p539_p2), 64  }
   0xc   : > { %s3089_s30 = sld [smem:[#allocation4_spill]] (!%p539_p2) }
   0xd   : > { %s3090_s23 = sld [smem:[#allocation5_spill]] (!%p539_p2) }
   0xf   : > { %v2192_v0 = vld [vmem:[%s3087_s1 + $0x8] sm:$0xff]  ;;  %v2191_v1 = vld [vmem:[%s3087_s1] sm:$0xff]  ;;  %s3092_s22 = smov (!%p595_p3, %s2081_s22), 15  ;;  %vm639_vm0 = vcmask 261120   ;;  %vm868_vm1 = vcmask 523264  }
  0x10   : > { %658 = vmatpush.bf16.msra.mxu0 %v2192_v0  ;;  %2205 = vmatpush.bf16.msra.mxu1 %v2192_v0  ;;  %s2082_s24 = sshll.u32 %s3092_s22, 3  ;;  %v2194_v51 = vld [vmem:[%s3066_s5 + $0x8] sm:$0xff]  ;;  %v2193_v54 = vld [vmem:[%s3066_s5] sm:$0xff] }
  0x11   : > { %2206 = vmatpush.bf16.msra.mxu2 %v2192_v0  ;;  %2207 = vmatpush.bf16.msra.mxu3 %v2192_v0  ;;  %s598_s27 = scalar_lea.vmem %s3088_s26, %s2082_s24  ;;  %s604_s28 = scalar_lea.vmem %s3080_s19, %s2082_s24 }
  0x12   : > { %v607_v2 = vld [vmem:[%s598_s27] sm:$0xff]  ;;  %v608_v3 = vld [vmem:[%s598_s27 + $0x8] sm:$0xff]  ;;  %v609_v4 = vld [vmem:[%s598_s27 + $0x10] sm:$0xff] }
  0x13   : > { %v2447_v5 = vpack.c.bf16 %v608_v3, %v607_v2  ;;  %v610_v6 = vld [vmem:[%s598_s27 + $0x18] sm:$0xff]  ;;  %v611_v7 = vld [vmem:[%s598_s27 + $0x20] sm:$0xff]  ;;  %v612_v8 = vld [vmem:[%s598_s27 + $0x28] sm:$0xff] }
  0x14   : > { %659 = vmatpush.bf16.msra.mxu0 %v2191_v1  ;;  %2208 = vmatpush.bf16.msra.mxu1 %v2191_v1  ;;  %v2449_v9 = vpack.c.bf16 %v610_v6, %v609_v4  ;;  %v2451_v10 = vpack.c.bf16 %v612_v8, %v611_v7  ;;  %v613_v11 = vld [vmem:[%s598_s27 + $0x30] sm:$0xff]  ;;  %v614_v12 = vld [vmem:[%s598_s27 + $0x38] sm:$0xff]  ;;  %v2222_v14 = vld [vmem:[%s3089_s30] ss:$0 sm:$0xff] }
  0x15   : > { %2209 = vmatpush.bf16.msra.mxu2 %v2191_v1  ;;  %2210 = vmatpush.bf16.msra.mxu3 %v2191_v1  ;;  %v2455_v13 = vpack.c.bf16 %v614_v12, %v613_v11  ;;  %v2198_v49 = vld [vmem:[%s3090_s23 + $0x18] sm:$0xff]  ;;  %v2197_v50 = vld [vmem:[%s3090_s23 + $0x10] sm:$0xff]  ;;  %v2196_v53 = vld [vmem:[%s3090_s23 + $0x8] sm:$0xff] }
  0x16   : > { %v2195_v56 = vld [vmem:[%s3090_s23] sm:$0xff] }
  0x17   : > { %2093 = vmatmul.msk.bf16.vlgmr.msra.gmra.mxu0 %vm639_vm0, %v2447_v5  ;;  %2094 = vmatmul.msk.bf16.vlgmr.msra.gmra.mxu1 %vm639_vm0, %v2449_v9 }
  0x18   : > { %2095 = vmatmul.msk.bf16.vlgmr.msra.gmra.mxu2 %vm639_vm0, %v2451_v10  ;;  %2096 = vmatmul.msk.bf16.vlgmr.msra.gmra.mxu3 %vm639_vm0, %v2455_v13 }
  0x19   : > { %885 = vmatpush.bf16.msrb.mxu2 %v2198_v49  ;;  %715 = vmatpush.bf16.msrb.mxu1 %v2194_v51 }
  0x1d   : > { %886 = vmatpush.bf16.msrb.mxu2 %v2197_v50  ;;  %716 = vmatpush.bf16.msrb.mxu1 %v2193_v54  ;;  %v922_v54 = vld [vmem:[%s3068_s7 + $0x20] sm:$0xff] }
  0x21   : > { %887 = vmatpush.bf16.msrb.mxu2 %v2196_v53 }
  0x25   : > { %888 = vmatpush.bf16.msrb.mxu2 %v2195_v56  ;;  %v920_v56 = vld [vmem:[%s3068_s7 + $0x10] sm:$0xff] }
  0x27   : > { %2105 = vmatmul.msk.bf16.vlgmr.msrb.gmra.mxu1 %vm639_vm0, %v2447_v5 }
  0x37   : > { %2106 = vmatmul.msk.bf16.gmra.mxu1 %vm639_vm0, %v2449_v9 }
  0x47   : > { %2107 = vmatmul.msk.bf16.gmra.mxu1 %vm639_vm0, %v2451_v10  ;;  %v925_v10 = vld [vmem:[%s3068_s7 + $0x38] sm:$0xff] }
  0x48   : > { %958 = vmatpush.msrb.mxu3 %v925_v10  ;;  %1039 = vmatpush.msrb.mxu0 %v925_v10  ;;  %v1189_v10 = vld [vmem:[%s3069_s8 + $0x28] sm:$0xff] }
  0x57   : > { %2108 = vmatmul.msk.bf16.gmra.mxu1 %vm639_vm0, %v2455_v13  ;;  %v923_v13 = vld [vmem:[%s3068_s7 + $0x28] sm:$0xff] }
  0x94   : > { %v661_v15 = vpop.f32.mrf.mxu0  ;;  %v666_v17 = vpop.f32.mrf.mxu1 }
  0x95   : > { %v662_v16 = vadd.f32 %v2222_v14, %v661_v15  ;;  %v667_v18 = vadd.f32 %v2222_v14, %v666_v17 }
  0x97   : > { %745 = vrot.lane.b32.xlu0 %v662_v16, %s2322_s20  ;;  %749 = vrot.lane.b32.xlu1 %v667_v18, %s2322_s20  ;;  %2232 = vtanh.f32 %v662_v16 }
  0x98   : > { %2234 = vtanh.f32 %v667_v18 }
  0x9b   : > { %v671_v19 = vpop.f32.mrf.mxu2  ;;  %v676_v22 = vpop.f32.mrf.mxu3 }
  0x9c   : > { %v663_v20 = vpop.f32.mrf.mxu0  ;;  %v672_v21 = vadd.f32 %v2222_v14, %v671_v19  ;;  %v668_v24 = vpop.f32.mrf.mxu1  ;;  %v677_v28 = vadd.f32 %v2222_v14, %v676_v22 }
  0x9d   : > { %v664_v23 = vadd.f32 %v2222_v14, %v663_v20  ;;  %v669_v25 = vadd.f32 %v2222_v14, %v668_v24  ;;  %v2233_v26 = vpop.eup %2232 }
  0x9e   : > { %2236 = vtanh.f32 %v672_v21  ;;  %753 = vrot.lane.b32.xlu2 %v672_v21, %s2322_s20  ;;  %v2235_v27 = vpop.eup %2234  ;;  %v766_v63 = vmul.f32 0.0, %v2233_v26 }
  0x9f   : > { %2238 = vtanh.f32 %v664_v23  ;;  %747 = vrot.lane.b32.xlu0 %v664_v23, %s2322_s20  ;;  %751 = vrot.lane.b32.xlu1 %v669_v25, %s2322_s20 }
  0xa0   : > { %2240 = vtanh.f32 %v669_v25 }
  0xa1   : > { %2242 = vtanh.f32 %v677_v28 }
  0xa3   : > { %v673_v29 = vpop.f32.mrf.mxu2  ;;  %v678_v31 = vpop.f32.mrf.mxu3 }
  0xa4   : > { %v2237_v30 = vpop.eup %2236  ;;  %v674_v32 = vadd.f32 %v2222_v14, %v673_v29  ;;  %v679_v34 = vadd.f32 %v2222_v14, %v678_v31 }
  0xa5   : > { %v2239_v33 = vpop.eup %2238 }
  0xa6   : > { %v2241_v35 = vpop.eup %2240  ;;  %755 = vrot.lane.b32.xlu2 %v674_v32, %s2322_s20  ;;  %v787_v36 = vmul.f32 %v2239_v33, %v2235_v27  ;;  %v786_v37 = vmul.f32 %v2239_v33, %v2233_v26  ;;  %2244 = vtanh.f32 %v674_v32 }
  0xa7   : > { %757 = vrot.lane.b32.xlu0 %v677_v28, %s2322_s20  ;;  %v789_v38 = vmul.f32 %v2241_v35, %v2237_v30  ;;  %v788_v39 = vmul.f32 %v2241_v35, %v2235_v27  ;;  %775 = vrot.lane.b32.xlu1 %v679_v34, %s2322_s20  ;;  %v2243_v43 = vpop.eup %2242  ;;  %2246 = vtanh.f32 %v679_v34 }
  0xa8   : > { %v808_v40 = vmul.f32 %v2233_v26, %v787_v36  ;;  %v793_v15 = vmul.f32 0.0, %v786_v37 }
  0xa9   : > { %v810_v41 = vmul.f32 %v789_v38, %v787_v36  ;;  %v809_v42 = vmul.f32 %v788_v39, %v786_v37 }
  0xaa   : > { %v814_v18 = vmul.f32 0.0, %v808_v40 }
  0xab   : > { %v815_v22 = vmul.f32 0.0, %v809_v42 }
  0xac   : > { %v2245_v44 = vpop.eup %2244 }
  0xad   : > { %v790_v45 = vmul.f32 %v2245_v44, %v2237_v30  ;;  %v791_v46 = vmul.f32 %v2245_v44, %v2243_v43  ;;  %v2247_v52 = vpop.eup %2246 }
  0xae   : > { %v792_v55 = vmul.f32 %v2247_v52, %v2243_v43 }
  0xaf   : > { %v811_v47 = vmul.f32 %v790_v45, %v788_v39  ;;  %v812_v48 = vmul.f32 %v791_v46, %v789_v38 }
  0xb0   : > { %v813_v57 = vmul.f32 %v792_v55, %v790_v45 }
  0xf8   : > { %v754_v58 = vpop.permute.xlu2 %753 }
  0xf9   : > { %v771_v59 = vmul.f32 %v2245_v44, %v754_v58 }
 0x100   : > { %v756_v60 = vpop.permute.xlu2 %755 }
 0x101   : > { %v783_v61 = vadd.f32 %v771_v59, %v756_v60  ;;  %v772_v24 = vmul.f32 %v2243_v43, %v756_v60  ;;  %v718_v59 = vpop.f32.mrf.mxu1 }
 0x103   : > { %v799_v62 = vmul.f32 %v792_v55, %v783_v61  ;;  %v921_v55 = vld [vmem:[%s3068_s7 + $0x18] sm:$0xff] }
 0x109   : > { %v746_v0 = vpop.permute.xlu0 %745  ;;  %v750_v1 = vpop.permute.xlu1 %749 }
 0x10a   : > { %v778_v2 = vadd.f32 %v766_v63, %v746_v0  ;;  %v767_v7 = vmul.f32 %v2239_v33, %v746_v0  ;;  %v769_v8 = vmul.f32 %v2241_v35, %v750_v1  ;;  %v720_v60 = vpop.f32.mrf.mxu1 }
 0x10c   : > { %v794_v3 = vmul.f32 %v787_v36, %v778_v2  ;;  %v800_v4 = vadd.f32 %v778_v2, %v766_v63 }
 0x10e   : > { %v816_v6 = vmul.f32 %v810_v41, %v800_v4  ;;  %v820_v31 = vadd.f32 %v800_v4, %v766_v63 }
 0x111   : > { %v748_v11 = vpop.permute.xlu0 %747  ;;  %v752_v12 = vpop.permute.xlu1 %751 }
 0x112   : > { %v768_v14 = vmul.f32 %v2235_v27, %v748_v11  ;;  %v779_v5 = vadd.f32 %v767_v7, %v748_v11  ;;  %v770_v16 = vmul.f32 %v2237_v30, %v752_v12  ;;  %v781_v17 = vadd.f32 %v769_v8, %v752_v12  ;;  %v723_v2 = vpop.f32.mrf.mxu1 }
 0x114   : > { %v780_v19 = vadd.f32 %v768_v14, %v750_v1  ;;  %v795_v20 = vmul.f32 %v788_v39, %v779_v5  ;;  %v801_v21 = vadd.f32 %v793_v15, %v779_v5  ;;  %v782_v9 = vadd.f32 %v770_v16, %v754_v58  ;;  %v918_v58 = vld [vmem:[%s3068_s7] sm:$0xff] }
 0x115   : > { %v797_v23 = vmul.f32 %v790_v45, %v781_v17 }
 0x116   : > { %v796_v25 = vmul.f32 %v789_v38, %v780_v19  ;;  %v802_v26 = vadd.f32 %v794_v3, %v780_v19  ;;  %v803_v28 = vadd.f32 %v795_v20, %v781_v17  ;;  %v817_v29 = vmul.f32 %v811_v47, %v801_v21 }
 0x117   : > { %v821_v32 = vadd.f32 %v801_v21, %v793_v15  ;;  %v805_v27 = vadd.f32 %v797_v23, %v783_v61  ;;  %v798_v33 = vmul.f32 %v791_v46, %v782_v9  ;;  %v2223_v61 = vld [vmem:[%s3067_s6] ss:$0 sm:$0xff] }
 0x118   : > { %v804_v34 = vadd.f32 %v796_v25, %v782_v9  ;;  %v818_v30 = vmul.f32 %v812_v48, %v802_v26  ;;  %v819_v35 = vmul.f32 %v813_v57, %v803_v28  ;;  %v822_v36 = vadd.f32 %v814_v18, %v802_v26  ;;  %v919_v57 = vld [vmem:[%s3068_s7 + $0x8] sm:$0xff] }
 0x119   : > { %v825_v37 = vadd.f32 %v817_v29, %v805_v27  ;;  %v758_v39 = vpop.permute.xlu0 %757  ;;  %v828_v40 = vpack.c.bf16 %v821_v32, %v820_v31  ;;  %v823_v41 = vadd.f32 %v815_v22, %v803_v28  ;;  %v776_v43 = vpop.permute.xlu1 %775  ;;  %v2534_v63 = vadd.f32 %v2223_v61, %v718_v59 }
 0x11a   : > { %v773_v42 = vmul.f32 %v2247_v52, %v758_v39  ;;  %v784_v38 = vadd.f32 %v772_v24, %v758_v39  ;;  %v824_v44 = vadd.f32 %v816_v6, %v804_v34  ;;  %v924_v52 = vld [vmem:[%s3068_s7 + $0x30] sm:$0xff]  ;;  %v2538_v6 = vadd.f32 %v2223_v61, %v720_v60  ;;  %v725_v11 = vpop.f32.mrf.mxu1 }
 0x11b   : > { %2125 = vmatmul.msk.bf16.vlgmr.msrb.gmra.mxu2 %vm868_vm1, %v828_v40  ;;  %v829_v45 = vpack.c.bf16 %v823_v41, %v822_v36  ;;  %959 = vmatpush.msrb.mxu3 %v924_v52  ;;  %v2542_v12 = vadd.f32 %v2223_v61, %v723_v2  ;;  %v2546_v17 = vadd.f32 %v2223_v61, %v725_v11 }
 0x11c   : > { %v806_v47 = vadd.f32 %v798_v33, %v784_v38  ;;  %v785_v46 = vadd.f32 %v776_v43, %v773_v42  ;;  %v830_v49 = vpack.c.bf16 %v825_v37, %v824_v44  ;;  %1040 = vmatpush.msrb.mxu0 %v924_v52 }
 0x11d   : > { %960 = vmatpush.msrb.mxu3 %v923_v13 }
 0x11e   : > { %v826_v48 = vadd.f32 %v818_v30, %v806_v47  ;;  %v807_v50 = vadd.f32 %v799_v62, %v785_v46  ;;  %1041 = vmatpush.msrb.mxu0 %v923_v13  ;;  %v2224_v62 = vld [vmem:[%s3065_s4] ss:$0 sm:$0xff] }
 0x11f   : > { %961 = vmatpush.msrb.mxu3 %v922_v54 }
 0x120   : > { %v827_v51 = vadd.f32 %v819_v35, %v807_v50  ;;  %1042 = vmatpush.msrb.mxu0 %v922_v54  ;;  %v1188_v54 = vld [vmem:[%s3069_s8 + $0x20] sm:$0xff] }
 0x121   : > { %962 = vmatpush.msrb.mxu3 %v921_v55 }
 0x122   : > { %v831_v53 = vpack.c.bf16 %v827_v51, %v826_v48  ;;  %1043 = vmatpush.msrb.mxu0 %v921_v55  ;;  %v728_v16 = vpop.f32.mrf.mxu1  ;;  %v1191_v51 = vld [vmem:[%s3069_s8 + $0x38] sm:$0xff] }
 0x123   : > { %963 = vmatpush.msrb.mxu3 %v920_v56  ;;  %v2550_v21 = vadd.f32 %v2223_v61, %v728_v16  ;;  %1224 = vmatpush.msra.mxu1 %v1191_v51 }
 0x124   : > { %1044 = vmatpush.msrb.mxu0 %v920_v56  ;;  %v1187_v56 = vld [vmem:[%s3069_s8 + $0x18] sm:$0xff] }
 0x125   : > { %964 = vmatpush.msrb.mxu3 %v919_v57 }
 0x126   : > { %1045 = vmatpush.msrb.mxu0 %v919_v57 }
 0x127   : > { %965 = vmatpush.msrb.mxu3 %v918_v58 }
 0x128   : > { %1046 = vmatpush.msrb.mxu0 %v918_v58 }
 0x12a   : > { %v730_v9 = vpop.f32.mrf.mxu1 }
 0x12b   : > { %2126 = vmatmul.msk.bf16.gmra.mxu2 %vm868_vm1, %v829_v45  ;;  %v2554_v25 = vadd.f32 %v2223_v61, %v730_v9 }
 0x132   : > { %v733_v29 = vpop.f32.mrf.mxu1 }
 0x133   : > { %v2558_v32 = vadd.f32 %v2223_v61, %v733_v29 }
 0x13a   : > { %v735_v30 = vpop.f32.mrf.mxu1 }
 0x13b   : > { %2127 = vmatmul.msk.bf16.gmra.mxu2 %vm868_vm1, %v830_v49  ;;  %v2562_v35 = vadd.f32 %v2223_v61, %v735_v30 }
 0x14b   : > { %2128 = vmatmul.msk.bf16.gmra.mxu2 %vm868_vm1, %v831_v53  ;;  %v1190_v53 = vld [vmem:[%s3069_s8 + $0x30] sm:$0xff] }
 0x14c   : > { %1225 = vmatpush.msra.mxu1 %v1190_v53 }
 0x14e   : > { %1226 = vmatpush.msra.mxu1 %v1189_v10 }
 0x150   : > { %1227 = vmatpush.msra.mxu1 %v1188_v54 }
 0x152   : > { %1228 = vmatpush.msra.mxu1 %v1187_v56 }
 0x19e   : > { %v890_v0 = vpop.f32.mrf.mxu2 }
 0x19f   : > { %v891_v1 = vadd.f32 %v2224_v62, %v890_v0 }
 0x1a1   : > { %v910_v3 = vadd.f32 %v891_v1, %v2534_v63 }
 0x1a3   : > { %2129 = vmatmul.msk.f32.vlgmr.msrb.gmra.mxu3 %vm868_vm1, %v910_v3 }
 0x1a6   : > { %v892_v4 = vpop.f32.mrf.mxu2 }
 0x1a7   : > { %v893_v7 = vadd.f32 %v2224_v62, %v892_v4  ;;  %v1185_v4 = vld [vmem:[%s3069_s8 + $0x8] sm:$0xff] }
 0x1a9   : > { %v911_v8 = vadd.f32 %v893_v7, %v2538_v6  ;;  %v1184_v7 = vld [vmem:[%s3069_s8] sm:$0xff] }
 0x1ab   : > { %2130 = vmatmul.msk.f32.gmra.mxu3 %vm868_vm1, %v911_v8 }
 0x1ae   : > { %v895_v14 = vpop.f32.mrf.mxu2 }
 0x1af   : > { %v896_v5 = vadd.f32 %v2224_v62, %v895_v14 }
 0x1b1   : > { %v912_v15 = vadd.f32 %v896_v5, %v2542_v12 }
 0x1b3   : > { %2131 = vmatmul.msk.f32.gmra.mxu3 %vm868_vm1, %v912_v15 }
 0x1b6   : > { %v897_v18 = vpop.f32.mrf.mxu2 }
 0x1b7   : > { %v898_v19 = vadd.f32 %v2224_v62, %v897_v18 }
 0x1b9   : > { %v913_v20 = vadd.f32 %v898_v19, %v2546_v17 }
 0x1bb   : > { %2132 = vmatmul.msk.f32.gmra.mxu3 %vm868_vm1, %v913_v20 }
 0x1be   : > { %v900_v22 = vpop.f32.mrf.mxu2 }
 0x1bf   : > { %v901_v23 = vadd.f32 %v2224_v62, %v900_v22 }
 0x1c1   : > { %v914_v24 = vadd.f32 %v901_v23, %v2550_v21 }
 0x1c3   : > { %2133 = vmatmul.msk.f32.gmra.mxu3 %vm868_vm1, %v914_v24 }
 0x1c6   : > { %v902_v26 = vpop.f32.mrf.mxu2 }
 0x1c7   : > { %v903_v28 = vadd.f32 %v2224_v62, %v902_v26 }
 0x1c9   : > { %v915_v31 = vadd.f32 %v903_v28, %v2554_v25  ;;  %v2633_v28 = vld [vmem:[%s3070_s9] ss:$0 sm:$0xff] }
 0x1cb   : > { %2134 = vmatmul.msk.f32.gmra.mxu3 %vm868_vm1, %v915_v31 }
 0x1ce   : > { %v905_v27 = vpop.f32.mrf.mxu2 }
 0x1cf   : > { %v906_v33 = vadd.f32 %v2224_v62, %v905_v27 }
 0x1d1   : > { %v916_v34 = vadd.f32 %v906_v33, %v2558_v32  ;;  %v2639_v33 = vld [vmem:[%s3071_s10] ss:$0 sm:$0xff] }
 0x1d3   : > { %2135 = vmatmul.msk.f32.gmra.mxu3 %vm868_vm1, %v916_v34 }
 0x1d6   : > { %v907_v36 = vpop.f32.mrf.mxu2 }
 0x1d7   : > { %v908_v37 = vadd.f32 %v2224_v62, %v907_v36 }
 0x1d9   : > { %v917_v39 = vadd.f32 %v908_v37, %v2562_v35 }
 0x1db   : > { %2136 = vmatmul.msk.f32.gmra.mxu3 %vm868_vm1, %v917_v39 }
 0x226   : > { %v967_v40 = vpop.f32.mrf.mxu3 }
 0x227   : > { %v2566_v41 = vsub.f32 %v910_v3, %v967_v40  ;;  %v1186_v3 = vld [vmem:[%s3069_s8 + $0x10] sm:$0xff] }
 0x228   : > { %1229 = vmatpush.msra.mxu1 %v1186_v3 }
 0x229   : > { %v999_v42 = vmul.f32 %v2566_v41, %v2566_v41 }
 0x22a   : > { %1230 = vmatpush.msra.mxu1 %v1185_v4 }
 0x22b   : > { %2137 = vmatmul.msk.f32.vlgmr.msrb.gmra.mxu0 %vm868_vm1, %v999_v42 }
 0x22c   : > { %1231 = vmatpush.msra.mxu1 %v1184_v7 }
 0x22e   : > { %v970_v38 = vpop.f32.mrf.mxu3 }
 0x22f   : > { %v2571_v43 = vsub.f32 %v911_v8, %v970_v38 }
 0x231   : > { %v1000_v44 = vmul.f32 %v2571_v43, %v2571_v43 }
 0x233   : > { %2138 = vmatmul.msk.f32.gmra.mxu0 %vm868_vm1, %v1000_v44 }
 0x236   : > { %v973_v45 = vpop.f32.mrf.mxu3 }
 0x237   : > { %v2576_v47 = vsub.f32 %v912_v15, %v973_v45 }
 0x239   : > { %v1001_v46 = vmul.f32 %v2576_v47, %v2576_v47 }
 0x23b   : > { %2139 = vmatmul.msk.f32.gmra.mxu0 %vm868_vm1, %v1001_v46 }
 0x23e   : > { %v976_v49 = vpop.f32.mrf.mxu3 }
 0x23f   : > { %v2581_v48 = vsub.f32 %v913_v20, %v976_v49 }
 0x241   : > { %v1002_v50 = vmul.f32 %v2581_v48, %v2581_v48 }
 0x243   : > { %2140 = vmatmul.msk.f32.gmra.mxu0 %vm868_vm1, %v1002_v50 }
 0x246   : > { %v979_v52 = vpop.f32.mrf.mxu3 }
 0x247   : > { %v2595_v13 = vsub.f32 %v914_v24, %v979_v52 }
 0x249   : > { %v1003_v55 = vmul.f32 %v2595_v13, %v2595_v13 }
 0x24b   : > { %2141 = vmatmul.msk.f32.gmra.mxu0 %vm868_vm1, %v1003_v55 }
 0x24e   : > { %v982_v57 = vpop.f32.mrf.mxu3 }
 0x24f   : > { %v2606_v58 = vsub.f32 %v915_v31, %v982_v57 }
 0x251   : > { %v1004_v59 = vmul.f32 %v2606_v58, %v2606_v58 }
 0x253   : > { %2142 = vmatmul.msk.f32.gmra.mxu0 %vm868_vm1, %v1004_v59 }
 0x256   : > { %v985_v60 = vpop.f32.mrf.mxu3 }
 0x257   : > { %v2611_v61 = vsub.f32 %v916_v34, %v985_v60 }
 0x259   : > { %v1005_v62 = vmul.f32 %v2611_v61, %v2611_v61 }
 0x25b   : > { %2143 = vmatmul.msk.f32.gmra.mxu0 %vm868_vm1, %v1005_v62 }
 0x25e   : > { %v988_v0 = vpop.f32.mrf.mxu3 }
 0x25f   : > { %v2616_v1 = vsub.f32 %v917_v39, %v988_v0 }
 0x261   : > { %v1006_v2 = vmul.f32 %v2616_v1, %v2616_v1 }
 0x263   : > { %2144 = vmatmul.msk.f32.gmra.mxu0 %vm868_vm1, %v1006_v2 }
 0x2a8   : > { %v1048_v8 = vpop.f32.mrf.mxu0 }
 0x2a9   : > { %v1049_v11 = vadd.f32 1e-05, %v1048_v8 }
 0x2ab   : > { %2248 = vrsqrt.f32 %v1049_v11  ;;  %vm1078_vm3 = vweird.f32 %v1049_v11 }
 0x2b0   : > { %v1051_v14 = vpop.f32.mrf.mxu0 }
 0x2b1   : > { %v2249_v5 = vpop.eup %2248  ;;  %v1052_v15 = vadd.f32 1e-05, %v1051_v14 }
 0x2b2   : > { %v1073_v16 = vmul.f32 %v2249_v5, %v1049_v11  ;;  %vm1079_vm2 = vweird.f32 %v2249_v5 }
 0x2b3   : > { %2250 = vrsqrt.f32 %v1052_v15  ;;  %vm1080_vm4 = vmor %vm1078_vm3, %vm1079_vm2  ;;  %vm1088_vm6 = vweird.f32 %v1052_v15 }
 0x2b4   : > { %v1074_v18 = vmul.f32 %v2249_v5, %v1073_v16 }
 0x2b6   : > { %v1075_v19 = vmul.f32 0.5, %v1074_v18 }
 0x2b8   : > { %v1076_v20 = vsub.f32 1.5, %v1075_v19  ;;  %v1054_v22 = vpop.f32.mrf.mxu0 }
 0x2b9   : > { %v2251_v9 = vpop.eup %2250  ;;  %v1055_v23 = vadd.f32 1e-05, %v1054_v22 }
 0x2ba   : > { %v1077_v24 = vmul.f32 %v2249_v5, %v1076_v20  ;;  %v1083_v26 = vmul.f32 %v2251_v9, %v1052_v15  ;;  %vm1089_vm5 = vweird.f32 %v2251_v9 }
 0x2bb   : > { %2252 = vrsqrt.f32 %v1055_v23  ;;  %vm1090_vm7 = vmor %vm1088_vm6, %vm1089_vm5  ;;  %vm1098_vm9 = vweird.f32 %v1055_v23 }
 0x2bc   : > { %v1081_v29 = vsel %vm1080_vm4, %v2249_v5, %v1077_v24  ;;  %v1084_v31 = vmul.f32 %v2251_v9, %v1083_v26 }
 0x2bd   : > { %v1152_v27 = vmul.f32 %v1081_v29, %v2566_v41 }
 0x2be   : > { %v1085_v34 = vmul.f32 0.5, %v1084_v31 }
 0x2bf   : > { %v1164_v30 = vmul.f32 %v2633_v28, %v1152_v27 }
 0x2c0   : > { %v1086_v36 = vsub.f32 1.5, %v1085_v34  ;;  %v1057_v37 = vpop.f32.mrf.mxu0 }
 0x2c1   : > { %v2253_v39 = vpop.eup %2252  ;;  %v1058_v40 = vadd.f32 1e-05, %v1057_v37  ;;  %v1176_v42 = vadd.f32 %v2639_v33, %v1164_v30 }
 0x2c2   : > { %v1087_v38 = vmul.f32 %v2251_v9, %v1086_v36  ;;  %v1093_v44 = vmul.f32 %v2253_v39, %v1055_v23  ;;  %vm1099_vm8 = vweird.f32 %v2253_v39 }
 0x2c3   : > { %2254 = vrsqrt.f32 %v1058_v40  ;;  %2145 = vmatmul.msk.f32.vlgmr.msra.gmra.mxu1 %vm868_vm1, %v1176_v42  ;;  %vm1100_vm10 = vmor %vm1098_vm9, %vm1099_vm8  ;;  %vm1108_vm12 = vweird.f32 %v1058_v40 }
 0x2c4   : > { %v1091_v41 = vsel %vm1090_vm7, %v2251_v9, %v1087_v38  ;;  %v1094_v45 = vmul.f32 %v2253_v39, %v1093_v44 }
 0x2c5   : > { %v1153_v46 = vmul.f32 %v1091_v41, %v2571_v43 }
 0x2c6   : > { %v1095_v49 = vmul.f32 0.5, %v1094_v45 }
 0x2c7   : > { %v1165_v50 = vmul.f32 %v2633_v28, %v1153_v46 }
 0x2c8   : > { %v1096_v51 = vsub.f32 1.5, %v1095_v49  ;;  %v1060_v53 = vpop.f32.mrf.mxu0 }
 0x2c9   : > { %v2255_v10 = vpop.eup %2254  ;;  %v1061_v52 = vadd.f32 1e-05, %v1060_v53  ;;  %v1177_v54 = vadd.f32 %v2639_v33, %v1165_v50 }
 0x2ca   : > { %v1097_v55 = vmul.f32 %v2253_v39, %v1096_v51  ;;  %v1103_v56 = vmul.f32 %v2255_v10, %v1058_v40  ;;  %vm1109_vm11 = vweird.f32 %v2255_v10 }
 0x2cb   : > { %2256 = vrsqrt.f32 %v1061_v52  ;;  %2146 = vmatmul.msk.f32.gmra.mxu1 %vm868_vm1, %v1177_v54  ;;  %vm1110_vm13 = vmor %vm1108_vm12, %vm1109_vm11  ;;  %vm1118_vm15 = vweird.f32 %v1061_v52  ;;  %vm1275_vm11 = vcmask 130048  }
 0x2cc   : > { %v1101_v57 = vsel %vm1100_vm10, %v2253_v39, %v1097_v55  ;;  %v1104_v59 = vmul.f32 %v2255_v10, %v1103_v56 }
 0x2cd   : > { %v1154_v43 = vmul.f32 %v1101_v57, %v2576_v47 }
 0x2ce   : > { %v1105_v60 = vmul.f32 0.5, %v1104_v59 }
 0x2cf   : > { %v1166_v62 = vmul.f32 %v2633_v28, %v1154_v43 }
 0x2d0   : > { %v1106_v0 = vsub.f32 1.5, %v1105_v60  ;;  %v1063_v2 = vpop.f32.mrf.mxu0 }
 0x2d1   : > { %v2257_v3 = vpop.eup %2256  ;;  %v1064_v4 = vadd.f32 1e-05, %v1063_v2  ;;  %v1178_v7 = vadd.f32 %v2639_v33, %v1166_v62 }
 0x2d2   : > { %v1107_v8 = vmul.f32 %v2255_v10, %v1106_v0  ;;  %v1113_v11 = vmul.f32 %v2257_v3, %v1061_v52  ;;  %vm1119_vm14 = vweird.f32 %v2257_v3 }
 0x2d3   : > { %2258 = vrsqrt.f32 %v1064_v4  ;;  %2147 = vmatmul.msk.f32.gmra.mxu1 %vm868_vm1, %v1178_v7  ;;  %vm1120_vm0 = vmor %vm1118_vm15, %vm1119_vm14  ;;  %vm1128_vm3 = vweird.f32 %v1064_v4 }
 0x2d4   : > { %v1111_v14 = vsel %vm1110_vm13, %v2255_v10, %v1107_v8  ;;  %v1114_v5 = vmul.f32 %v2257_v3, %v1113_v11 }
 0x2d5   : > { %v1155_v47 = vmul.f32 %v1111_v14, %v2581_v48 }
 0x2d6   : > { %v1115_v15 = vmul.f32 0.5, %v1114_v5 }
 0x2d7   : > { %v1167_v16 = vmul.f32 %v2633_v28, %v1155_v47 }
 0x2d8   : > { %v1116_v18 = vsub.f32 1.5, %v1115_v15  ;;  %v1066_v19 = vpop.f32.mrf.mxu0 }
 0x2d9   : > { %v2259_v20 = vpop.eup %2258  ;;  %v1067_v22 = vadd.f32 1e-05, %v1066_v19  ;;  %v1179_v9 = vadd.f32 %v2639_v33, %v1167_v16 }
 0x2da   : > { %v1117_v23 = vmul.f32 %v2257_v3, %v1116_v18  ;;  %v1123_v24 = vmul.f32 %v2259_v20, %v1064_v4  ;;  %vm1129_vm2 = vweird.f32 %v2259_v20 }
 0x2db   : > { %2260 = vrsqrt.f32 %v1067_v22  ;;  %2148 = vmatmul.msk.f32.gmra.mxu1 %vm868_vm1, %v1179_v9  ;;  %vm1130_vm4 = vmor %vm1128_vm3, %vm1129_vm2  ;;  %vm1138_vm6 = vweird.f32 %v1067_v22 }
 0x2dc   : > { %v1121_v26 = vsel %vm1120_vm0, %v2257_v3, %v1117_v23  ;;  %v1124_v29 = vmul.f32 %v2259_v20, %v1123_v24 }
 0x2dd   : > { %v1156_v48 = vmul.f32 %v1121_v26, %v2595_v13 }
 0x2de   : > { %v1125_v31 = vmul.f32 0.5, %v1124_v29  ;;  %v2323_v29 = vmov 16.0  }
 0x2df   : > { %v1168_v27 = vmul.f32 %v2633_v28, %v1156_v48 }
 0x2e0   : > { %v1126_v34 = vsub.f32 1.5, %v1125_v31  ;;  %v1069_v30 = vpop.f32.mrf.mxu0 }
 0x2e1   : > { %v2261_v36 = vpop.eup %2260  ;;  %v1070_v37 = vadd.f32 1e-05, %v1069_v30  ;;  %v1180_v39 = vadd.f32 %v2639_v33, %v1168_v27 }
 0x2e2   : > { %v1127_v40 = vmul.f32 %v2259_v20, %v1126_v34  ;;  %v1133_v42 = vmul.f32 %v2261_v36, %v1067_v22  ;;  %vm1139_vm5 = vweird.f32 %v2261_v36 }
 0x2e3   : > { %2262 = vrsqrt.f32 %v1070_v37  ;;  %2149 = vmatmul.msk.f32.gmra.mxu1 %vm868_vm1, %v1180_v39  ;;  %vm1140_vm7 = vmor %vm1138_vm6, %vm1139_vm5  ;;  %vm1148_vm9 = vweird.f32 %v1070_v37 }
 0x2e4   : > { %v1131_v38 = vsel %vm1130_vm4, %v2259_v20, %v1127_v40  ;;  %v1134_v44 = vmul.f32 %v2261_v36, %v1133_v42  ;;  %2264 = vrcp.f32 %v2323_v29 }
 0x2e5   : > { %v1157_v13 = vmul.f32 %v1131_v38, %v2606_v58 }
 0x2e6   : > { %v1135_v41 = vmul.f32 0.5, %v1134_v44 }
 0x2e7   : > { %v1169_v45 = vmul.f32 %v2633_v28, %v1157_v13 }
 0x2e8   : > { %v1136_v46 = vsub.f32 1.5, %v1135_v41 }
 0x2e9   : > { %v2263_v49 = vpop.eup %2262  ;;  %v1181_v50 = vadd.f32 %v2639_v33, %v1169_v45 }
 0x2ea   : > { %v1137_v51 = vmul.f32 %v2261_v36, %v1136_v46  ;;  %v1143_v53 = vmul.f32 %v2263_v49, %v1070_v37  ;;  %vm1149_vm8 = vweird.f32 %v2263_v49  ;;  %v2265_v48 = vpop.eup %2264 }
 0x2eb   : > { %2150 = vmatmul.msk.f32.gmra.mxu1 %vm868_vm1, %v1181_v50  ;;  %vm1150_vm10 = vmor %vm1148_vm9, %vm1149_vm8  ;;  %v1301_v31 = vmul.f32 16.0, %v2265_v48  ;;  %vm1305_vm12 = vweird.f32 %v2265_v48 }
 0x2ec   : > { %v1141_v10 = vsel %vm1140_vm7, %v2261_v36, %v1137_v51  ;;  %v1144_v52 = vmul.f32 %v2263_v49, %v1143_v53 }
 0x2ed   : > { %v1158_v54 = vmul.f32 %v1141_v10, %v2611_v61 }
 0x2ee   : > { %v1145_v55 = vmul.f32 0.5, %v1144_v52 }
 0x2ef   : > { %v1170_v58 = vmul.f32 %v2633_v28, %v1158_v54 }
 0x2f0   : > { %v1146_v56 = vsub.f32 1.5, %v1145_v55 }
 0x2f1   : > { %v1182_v57 = vadd.f32 %v2639_v33, %v1170_v58 }
 0x2f2   : > { %v1147_v59 = vmul.f32 %v2263_v49, %v1146_v56 }
 0x2f3   : > { %2151 = vmatmul.msk.f32.gmra.mxu1 %vm868_vm1, %v1182_v57 }
 0x2f4   : > { %v1151_v43 = vsel %vm1150_vm10, %v2263_v49, %v1147_v59 }
 0x2f5   : > { %v1159_v60 = vmul.f32 %v1151_v43, %v2616_v1 }
 0x2f7   : > { %v1171_v62 = vmul.f32 %v2633_v28, %v1159_v60 }
 0x2f9   : > { %v1183_v0 = vadd.f32 %v2639_v33, %v1171_v62 }
 0x2fb   : > { %2152 = vmatmul.msk.f32.gmra.mxu1 %vm868_vm1, %v1183_v0 }
 0x340   : > { %v1233_v61 = vpop.f32.mrf.mxu1 }
 0x341   : > { %v1257_v2 = vadd.f32 %v1233_v61, %v2534_v63 }
 0x343   : > { %v2673_v3 = vmul.f32 0.25, %v1257_v2 }
 0x345   : > { %v1276_v4 = vsel %vm1275_vm11, %v2673_v3, 0.0 }
 0x346   : > { %1277 = vadd.xlane.f32.xlu2 %v1276_v4 }
 0x348   : > { %v1236_v7 = vpop.f32.mrf.mxu1 }
 0x349   : > { %v1258_v8 = vadd.f32 %v1236_v7, %v2538_v6 }
 0x34b   : > { %v2678_v1 = vmul.f32 0.25, %v1258_v8 }
 0x34d   : > { %v1279_v28 = vsel %vm1275_vm11, %v2678_v1, 0.0 }
 0x34e   : > { %1280 = vadd.xlane.f32.xlu0 %v1279_v28 }
 0x350   : > { %v1239_v33 = vpop.f32.mrf.mxu1 }
 0x351   : > { %v1259_v11 = vadd.f32 %v1239_v33, %v2542_v12 }
 0x353   : > { %v2683_v63 = vmul.f32 0.25, %v1259_v11 }
 0x355   : > { %v1282_v14 = vsel %vm1275_vm11, %v2683_v63, 0.0 }
 0x356   : > { %1283 = vadd.xlane.f32.xlu1 %v1282_v14 }
 0x358   : > { %v1242_v5 = vpop.f32.mrf.mxu1 }
 0x359   : > { %v1260_v47 = vadd.f32 %v1242_v5, %v2546_v17 }
 0x35b   : > { %v2688_v15 = vmul.f32 0.25, %v1260_v47 }
 0x35d   : > { %v1285_v6 = vsel %vm1275_vm11, %v2688_v15, 0.0 }
 0x35e   : > { %1286 = vadd.xlane.f32.xlu2 %v1285_v6 }
 0x360   : > { %v1245_v16 = vpop.f32.mrf.mxu1 }
 0x361   : > { %v1261_v18 = vadd.f32 %v1245_v16, %v2550_v21 }
 0x363   : > { %v2693_v19 = vmul.f32 0.25, %v1261_v18  ;;  %v2199_v18 = vld [vmem:[%s3074_s13] sm:$0xff] }
 0x364   : > { %1524 = vmatpush.bf16.msra.mxu2 %v2199_v18 }
 0x365   : > { %v1288_v12 = vsel %vm1275_vm11, %v2693_v19, 0.0 }
 0x366   : > { %1289 = vadd.xlane.f32.xlu2 %v1288_v12 }
 0x368   : > { %v1248_v20 = vpop.f32.mrf.mxu1 }
 0x369   : > { %v1262_v22 = vadd.f32 %v1248_v20, %v2554_v25  ;;  %v1302_v25 = vsub.f32 1.0, %v1301_v31 }
 0x36b   : > { %v2698_v9 = vmul.f32 0.25, %v1262_v22  ;;  %v1303_v27 = vmul.f32 %v2265_v48, %v1302_v25 }
 0x36d   : > { %v1291_v17 = vsel %vm1275_vm11, %v2698_v9, 0.0  ;;  %v1304_v34 = vadd.f32 %v2265_v48, %v1303_v27 }
 0x36e   : > { %1292 = vadd.xlane.f32.xlu0 %v1291_v17 }
 0x36f   : > { %v2707_v30 = vsel %vm1305_vm12, %v2265_v48, %v1304_v34 }
 0x370   : > { %v1251_v23 = vpop.f32.mrf.mxu1 }
 0x371   : > { %v1263_v24 = vadd.f32 %v1251_v23, %v2558_v32 }
 0x373   : > { %v2703_v26 = vmul.f32 0.25, %v1263_v24 }
 0x375   : > { %v1294_v21 = vsel %vm1275_vm11, %v2703_v26, 0.0 }
 0x376   : > { %1295 = vadd.xlane.f32.xlu0 %v1294_v21 }
 0x378   : > { %v1254_v39 = vpop.f32.mrf.mxu1 }
 0x379   : > { %v1264_v42 = vadd.f32 %v1254_v39, %v2562_v35 }
 0x37b   : > { %v2718_v41 = vmul.f32 0.25, %v1264_v42 }
 0x37d   : > { %v1297_v50 = vsel %vm1275_vm11, %v2718_v41, 0.0 }
 0x3b9   : > { %v1278_v36 = vpop.xlane.xlu2 %1277 }
 0x3ba   : > { %v1307_v37 = vmul.f32 %v2707_v30, %v1278_v36 }
 0x3bc   : > { %v2711_v32 = vsub.f32 %v2673_v3, %v1307_v37 }
 0x3be   : > { %v1323_v40 = vmul.f32 %v2711_v32, %v2711_v32 }
 0x3c0   : > { %v1331_v38 = vsel %vm1275_vm11, %v1323_v40, 0.0 }
 0x3c1   : > { %v1281_v44 = vpop.xlane.xlu0 %1280  ;;  %1332 = vadd.xlane.f32.xlu1 %v1331_v38 }
 0x3c2   : > { %v1308_v13 = vmul.f32 %v2707_v30, %v1281_v44 }
 0x3c4   : > { %v2721_v45 = vsub.f32 %v2678_v1, %v1308_v13 }
 0x3c6   : > { %v1324_v46 = vmul.f32 %v2721_v45, %v2721_v45 }
 0x3c8   : > { %v1334_v49 = vsel %vm1275_vm11, %v1324_v46, 0.0 }
 0x3c9   : > { %v1284_v35 = vpop.xlane.xlu1 %1283  ;;  %1335 = vadd.xlane.f32.xlu2 %v1334_v49  ;;  %1298 = vadd.xlane.f32.xlu1 %v1297_v50  ;;  %v2779_v50 = vld [vmem:[%s3072_s11] ss:$0 sm:$0xff] }
 0x3ca   : > { %v1309_v51 = vmul.f32 %v2707_v30, %v1284_v35 }
 0x3cc   : > { %v2730_v53 = vsub.f32 %v2683_v63, %v1309_v51 }
 0x3ce   : > { %v1325_v10 = vmul.f32 %v2730_v53, %v2730_v53 }
 0x3d0   : > { %v1337_v52 = vsel %vm1275_vm11, %v1325_v10, 0.0 }
 0x3d1   : > { %v1287_v54 = vpop.xlane.xlu2 %1286  ;;  %1338 = vadd.xlane.f32.xlu2 %v1337_v52 }
 0x3d2   : > { %v1310_v55 = vmul.f32 %v2707_v30, %v1287_v54 }
 0x3d4   : > { %v2737_v58 = vsub.f32 %v2688_v15, %v1310_v55 }
 0x3d6   : > { %v1326_v56 = vmul.f32 %v2737_v58, %v2737_v58 }
 0x3d8   : > { %v1340_v57 = vsel %vm1275_vm11, %v1326_v56, 0.0 }
 0x3d9   : > { %v1290_v59 = vpop.xlane.xlu2 %1289  ;;  %1341 = vadd.xlane.f32.xlu0 %v1340_v57  ;;  %v2786_v57 = vld [vmem:[%s3073_s12] ss:$0 sm:$0xff] }
 0x3da   : > { %v1311_v43 = vmul.f32 %v2707_v30, %v1290_v59 }
 0x3dc   : > { %v2744_v60 = vsub.f32 %v2693_v19, %v1311_v43 }
 0x3de   : > { %v1327_v62 = vmul.f32 %v2744_v60, %v2744_v60 }
 0x3e0   : > { %v1343_v0 = vsel %vm1275_vm11, %v1327_v62, 0.0 }
 0x3e1   : > { %v1293_v61 = vpop.xlane.xlu0 %1292  ;;  %1344 = vadd.xlane.f32.xlu1 %v1343_v0 }
 0x3e2   : > { %v1312_v2 = vmul.f32 %v2707_v30, %v1293_v61 }
 0x3e4   : > { %v2751_v4 = vsub.f32 %v2698_v9, %v1312_v2 }
 0x3e6   : > { %v1328_v7 = vmul.f32 %v2751_v4, %v2751_v4 }
 0x3e8   : > { %v1346_v8 = vsel %vm1275_vm11, %v1328_v7, 0.0 }
 0x3e9   : > { %1347 = vadd.xlane.f32.xlu2 %v1346_v8  ;;  %v1296_v28 = vpop.xlane.xlu0 %1295 }
 0x3ea   : > { %v1313_v33 = vmul.f32 %v2707_v30, %v1296_v28 }
 0x3ec   : > { %v2758_v11 = vsub.f32 %v2703_v26, %v1313_v33 }
 0x3ee   : > { %v1329_v14 = vmul.f32 %v2758_v11, %v2758_v11 }
 0x3f0   : > { %v1349_v5 = vsel %vm1275_vm11, %v1329_v14, 0.0 }
 0x3f1   : > { %1350 = vadd.xlane.f32.xlu0 %v1349_v5 }
 0x434   : > { %v1333_v47 = vpop.xlane.xlu1 %1332 }
 0x435   : > { %v1355_v6 = vmul.f32 %v1333_v47, %v2707_v30 }
 0x437   : > { %v1363_v16 = vadd.f32 1e-05, %v1355_v6 }
 0x439   : > { %2266 = vrsqrt.f32 %v1363_v16  ;;  %vm1377_vm14 = vweird.f32 %v1363_v16 }
 0x43c   : > { %v1336_v12 = vpop.xlane.xlu2 %1335  ;;  %v1299_v20 = vpop.xlane.xlu1 %1298 }
 0x43d   : > { %v1356_v22 = vmul.f32 %v1336_v12, %v2707_v30  ;;  %v1314_v17 = vmul.f32 %v2707_v30, %v1299_v20 }
 0x43f   : > { %v2267_v23 = vpop.eup %2266  ;;  %v1364_v24 = vadd.f32 1e-05, %v1356_v22  ;;  %v2770_v21 = vsub.f32 %v2718_v41, %v1314_v17 }
 0x440   : > { %v1372_v29 = vmul.f32 %v2267_v23, %v1363_v16  ;;  %vm1378_vm13 = vweird.f32 %v2267_v23 }
 0x441   : > { %2268 = vrsqrt.f32 %v1364_v24  ;;  %v1330_v48 = vmul.f32 %v2770_v21, %v2770_v21  ;;  %vm1379_vm15 = vmor %vm1377_vm14, %vm1378_vm13  ;;  %vm1387_vm2 = vweird.f32 %v1364_v24 }
 0x442   : > { %v1373_v31 = vmul.f32 %v2267_v23, %v1372_v29 }
 0x443   : > { %v1352_v25 = vsel %vm1275_vm11, %v1330_v48, 0.0 }
 0x444   : > { %v1374_v27 = vmul.f32 0.5, %v1373_v31  ;;  %v1339_v34 = vpop.xlane.xlu2 %1338  ;;  %1353 = vadd.xlane.f32.xlu1 %v1352_v25 }
 0x445   : > { %v1357_v36 = vmul.f32 %v1339_v34, %v2707_v30 }
 0x446   : > { %v1375_v37 = vsub.f32 1.5, %v1374_v27 }
 0x447   : > { %v2269_v39 = vpop.eup %2268  ;;  %v1365_v40 = vadd.f32 1e-05, %v1357_v36 }
 0x448   : > { %v1376_v42 = vmul.f32 %v2267_v23, %v1375_v37  ;;  %v1382_v38 = vmul.f32 %v2269_v39, %v1364_v24  ;;  %vm1388_vm0 = vweird.f32 %v2269_v39 }
 0x449   : > { %2270 = vrsqrt.f32 %v1365_v40  ;;  %vm1389_vm3 = vmor %vm1387_vm2, %vm1388_vm0  ;;  %vm1397_vm5 = vweird.f32 %v1365_v40 }
 0x44a   : > { %v1380_v44 = vsel %vm1379_vm15, %v2267_v23, %v1376_v42  ;;  %v1383_v13 = vmul.f32 %v2269_v39, %v1382_v38 }
 0x44b   : > { %v1451_v35 = vmul.f32 %v1380_v44, %v2711_v32 }
 0x44c   : > { %v1384_v46 = vmul.f32 0.5, %v1383_v13  ;;  %v1342_v49 = vpop.xlane.xlu0 %1341 }
 0x44d   : > { %v1358_v51 = vmul.f32 %v1342_v49, %v2707_v30  ;;  %v1462_v59 = vmul.f32 %v2779_v50, %v1451_v35 }
 0x44e   : > { %v1385_v10 = vsub.f32 1.5, %v1384_v46 }
 0x44f   : > { %v2271_v52 = vpop.eup %2270  ;;  %v1366_v54 = vadd.f32 1e-05, %v1358_v51  ;;  %v1473_v2 = vadd.f32 %v2786_v57, %v1462_v59 }
 0x450   : > { %v1386_v55 = vmul.f32 %v2269_v39, %v1385_v10  ;;  %v1392_v56 = vmul.f32 %v2271_v52, %v1365_v40  ;;  %vm1398_vm4 = vweird.f32 %v2271_v52 }
 0x451   : > { %2272 = vrsqrt.f32 %v1366_v54  ;;  %vm1399_vm6 = vmor %vm1397_vm5, %vm1398_vm4  ;;  %vm1407_vm8 = vweird.f32 %v1366_v54 }
 0x452   : > { %v1390_v43 = vsel %vm1389_vm3, %v2269_v39, %v1386_v55  ;;  %v1393_v32 = vmul.f32 %v2271_v52, %v1392_v56 }
 0x453   : > { %v1452_v62 = vmul.f32 %v1390_v43, %v2721_v45  ;;  %v2795_v45 = vadd.f32 %v1473_v2, %v2673_v3 }
 0x454   : > { %v1394_v0 = vmul.f32 0.5, %v1393_v32  ;;  %v1345_v61 = vpop.xlane.xlu1 %1344 }
 0x455   : > { %v1463_v7 = vmul.f32 %v2779_v50, %v1452_v62  ;;  %v1359_v8 = vmul.f32 %v1345_v61, %v2707_v30 }
 0x456   : > { %v1395_v28 = vsub.f32 1.5, %v1394_v0 }
 0x457   : > { %v2273_v33 = vpop.eup %2272  ;;  %v1474_v14 = vadd.f32 %v2786_v57, %v1463_v7  ;;  %v1367_v5 = vadd.f32 1e-05, %v1359_v8 }
 0x458   : > { %v1396_v47 = vmul.f32 %v2271_v52, %v1395_v28  ;;  %v1402_v6 = vmul.f32 %v2273_v33, %v1366_v54  ;;  %vm1408_vm7 = vweird.f32 %v2273_v33 }
 0x459   : > { %2274 = vrsqrt.f32 %v1367_v5  ;;  %v2798_v16 = vadd.f32 %v1474_v14, %v2678_v1  ;;  %vm1409_vm9 = vmor %vm1407_vm8, %vm1408_vm7  ;;  %vm1417_vm12 = vweird.f32 %v1367_v5 }
 0x45a   : > { %v1400_v18 = vsel %vm1399_vm6, %v2271_v52, %v1396_v47  ;;  %v1403_v12 = vmul.f32 %v2273_v33, %v1402_v6 }
 0x45b   : > { %v1489_v20 = vpack.c.bf16 %v2798_v16, %v2795_v45  ;;  %v1453_v23 = vmul.f32 %v1400_v18, %v2730_v53 }
 0x45c   : > { %v1404_v22 = vmul.f32 0.5, %v1403_v12  ;;  %v1348_v17 = vpop.xlane.xlu2 %1347 }
 0x45d   : > { %v1360_v24 = vmul.f32 %v1348_v17, %v2707_v30  ;;  %2157 = vmatmul.msk.bf16.vlgmr.msra.gmra.mxu2 %vm1275_vm11, %v1489_v20  ;;  %v1464_v25 = vmul.f32 %v2779_v50, %v1453_v23 }
 0x45e   : > { %v1405_v29 = vsub.f32 1.5, %v1404_v22 }
 0x45f   : > { %v2275_v3 = vpop.eup %2274  ;;  %v1368_v48 = vadd.f32 1e-05, %v1360_v24  ;;  %v1475_v39 = vadd.f32 %v2786_v57, %v1464_v25 }
 0x460   : > { %v1406_v31 = vmul.f32 %v2273_v33, %v1405_v29  ;;  %v1412_v1 = vmul.f32 %v2275_v3, %v1367_v5  ;;  %vm1418_vm10 = vweird.f32 %v2275_v3 }
 0x461   : > { %2276 = vrsqrt.f32 %v1368_v48  ;;  %vm1419_vm13 = vmor %vm1417_vm12, %vm1418_vm10  ;;  %v2811_v46 = vadd.f32 %v1475_v39, %v2683_v63  ;;  %vm1427_vm15 = vweird.f32 %v1368_v48 }
 0x462   : > { %v1410_v27 = vsel %vm1409_vm9, %v2273_v33, %v1406_v31  ;;  %v1413_v34 = vmul.f32 %v2275_v3, %v1412_v1 }
 0x463   : > { %v1454_v36 = vmul.f32 %v1410_v27, %v2737_v58 }
 0x464   : > { %v1414_v53 = vmul.f32 0.5, %v1413_v34  ;;  %v1351_v61 = vpop.xlane.xlu0 %1350 }
 0x465   : > { %v1465_v37 = vmul.f32 %v2779_v50, %v1454_v36 }
 0x466   : > { %v1415_v40 = vsub.f32 1.5, %v1414_v53 }
 0x467   : > { %v2277_v42 = vpop.eup %2276  ;;  %v1476_v38 = vadd.f32 %v2786_v57, %v1465_v37 }
 0x468   : > { %v1416_v44 = vmul.f32 %v2275_v3, %v1415_v40  ;;  %v1422_v13 = vmul.f32 %v2277_v42, %v1368_v48  ;;  %vm1428_vm14 = vweird.f32 %v2277_v42 }
 0x469   : > { %v2814_v49 = vadd.f32 %v1476_v38, %v2688_v15  ;;  %vm1429_vm0 = vmor %vm1427_vm15, %vm1428_vm14 }
 0x46a   : > { %v1420_v58 = vsel %vm1419_vm13, %v2275_v3, %v1416_v44  ;;  %v1423_v35 = vmul.f32 %v2277_v42, %v1422_v13 }
 0x46b   : > { %v1490_v51 = vpack.c.bf16 %v2814_v49, %v2811_v46  ;;  %v1455_v52 = vmul.f32 %v1420_v58, %v2744_v60 }
 0x46c   : > { %v1424_v10 = vmul.f32 0.5, %v1423_v35 }
 0x46d   : > { %2158 = vmatmul.msk.bf16.gmra.mxu2 %vm1275_vm11, %v1490_v51  ;;  %v1466_v63 = vmul.f32 %v2779_v50, %v1455_v52 }
 0x46e   : > { %v1425_v54 = vsub.f32 1.5, %v1424_v10 }
 0x46f   : > { %v1477_v43 = vadd.f32 %v2786_v57, %v1466_v63 }
 0x470   : > { %v1426_v55 = vmul.f32 %v2277_v42, %v1425_v54 }
 0x471   : > { %v2826_v60 = vadd.f32 %v1477_v43, %v2693_v19 }
 0x472   : > { %v1430_v56 = vsel %vm1429_vm0, %v2277_v42, %v1426_v55 }
 0x473   : > { %v1456_v15 = vmul.f32 %v1430_v56, %v2751_v4  ;;  %v1361_v4 = vmul.f32 %v1351_v61, %v2707_v30 }
 0x475   : > { %v1467_v59 = vmul.f32 %v2779_v50, %v1456_v15  ;;  %v1369_v2 = vadd.f32 1e-05, %v1361_v4 }
 0x477   : > { %v1478_v32 = vadd.f32 %v2786_v57, %v1467_v59  ;;  %2278 = vrsqrt.f32 %v1369_v2  ;;  %vm1437_vm3 = vweird.f32 %v1369_v2 }
 0x479   : > { %v2829_v62 = vadd.f32 %v1478_v32, %v2698_v9 }
 0x47b   : > { %v1491_v0 = vpack.c.bf16 %v2829_v62, %v2826_v60 }
 0x47d   : > { %2159 = vmatmul.msk.bf16.gmra.mxu2 %vm1275_vm11, %v1491_v0  ;;  %v2279_v7 = vpop.eup %2278 }
 0x47e   : > { %v1432_v8 = vmul.f32 %v2279_v7, %v1369_v2  ;;  %vm1438_vm2 = vweird.f32 %v2279_v7 }
 0x47f   : > { %vm1439_vm4 = vmor %vm1437_vm3, %vm1438_vm2 }
 0x480   : > { %v1433_v28 = vmul.f32 %v2279_v7, %v1432_v8 }
 0x482   : > { %v1434_v14 = vmul.f32 0.5, %v1433_v28  ;;  %v2203_v28 = vld [vmem:[%s3076_s15 + $0x18] sm:$0xff] }
 0x483   : > { %1922 = vmatpush.bf16.msra.mxu3 %v2203_v28 }
 0x484   : > { %v1435_v9 = vsub.f32 1.5, %v1434_v14 }
 0x486   : > { %v1436_v47 = vmul.f32 %v2279_v7, %v1435_v9 }
 0x488   : > { %v1440_v12 = vsel %vm1439_vm4, %v2279_v7, %v1436_v47 }
 0x489   : > { %v1457_v17 = vmul.f32 %v1440_v12, %v2758_v11 }
 0x4b7   : > { %v1354_v33 = vpop.xlane.xlu1 %1353 }
 0x4b8   : > { %v1362_v19 = vmul.f32 %v1354_v33, %v2707_v30  ;;  %v1468_v30 = vmul.f32 %v2779_v50, %v1457_v17 }
 0x4ba   : > { %v1370_v5 = vadd.f32 1e-05, %v1362_v19  ;;  %v1479_v31 = vadd.f32 %v2786_v57, %v1468_v30 }
 0x4bc   : > { %2280 = vrsqrt.f32 %v1370_v5  ;;  %vm1447_vm6 = vweird.f32 %v1370_v5  ;;  %v2843_v25 = vadd.f32 %v1479_v31, %v2703_v26 }
 0x4c2   : > { %v2281_v6 = vpop.eup %2280 }
 0x4c3   : > { %v1442_v18 = vmul.f32 %v2281_v6, %v1370_v5  ;;  %vm1448_vm5 = vweird.f32 %v2281_v6 }
 0x4c4   : > { %vm1449_vm7 = vmor %vm1447_vm6, %vm1448_vm5 }
 0x4c5   : > { %v1443_v20 = vmul.f32 %v2281_v6, %v1442_v18 }
 0x4c7   : > { %v1444_v22 = vmul.f32 0.5, %v1443_v20  ;;  %v2202_v20 = vld [vmem:[%s3076_s15 + $0x10] sm:$0xff] }
 0x4c8   : > { %1923 = vmatpush.bf16.msra.mxu3 %v2202_v20 }
 0x4c9   : > { %v1445_v23 = vsub.f32 1.5, %v1444_v22 }
 0x4cb   : > { %v1446_v24 = vmul.f32 %v2281_v6, %v1445_v23 }
 0x4cd   : > { %v1450_v29 = vsel %vm1449_vm7, %v2281_v6, %v1446_v24 }
 0x4ce   : > { %v1458_v3 = vmul.f32 %v1450_v29, %v2770_v21  ;;  %v2854_v21 = vld [vmem:[%s3075_s14] ss:$0 sm:$0xff] }
 0x4d0   : > { %v1469_v48 = vmul.f32 %v2779_v50, %v1458_v3 }
 0x4d2   : > { %v1480_v1 = vadd.f32 %v2786_v57, %v1469_v48 }
 0x4d4   : > { %v2846_v11 = vadd.f32 %v1480_v1, %v2718_v41 }
 0x4d6   : > { %v1492_v27 = vpack.c.bf16 %v2846_v11, %v2843_v25 }
 0x4d8   : > { %2160 = vmatmul.msk.bf16.gmra.mxu2 %vm1275_vm11, %v1492_v27 }
 0x4e0   : > { %v1526_v50 = vpop.f32.mrf.mxu2 }
 0x4e1   : > { %v2857_v34 = vadd.f32 %v2854_v21, %v1526_v50 }
 0x4e3   : > { %v2860_v26 = vmul.f32 0.70710677, %v2857_v34 }
 0x4e5   : > { %v1578_v41 = vand.u32 2147483647, %v2860_v26  ;;  %vm1562_vm6 = vcmp.ge.f32.partialorder %v2860_v26, 0.0 }
 0x4e7   : > { %v1586_v57 = vmul.f32 0.3275911, %v1578_v41  ;;  %v1794_v2 = vsub.f32 0.0, %v1578_v41 }
 0x4e8   : > { %v1528_v36 = vpop.f32.mrf.mxu2 }
 0x4e9   : > { %v1594_v53 = vadd.f32 1.0, %v1586_v57  ;;  %v2864_v37 = vadd.f32 %v2854_v21, %v1528_v36  ;;  %v1802_v9 = vmul.f32 %v1794_v2, %v1578_v41  ;;  %v2201_v57 = vld [vmem:[%s3076_s15 + $0x8] sm:$0xff] }
 0x4ea   : > { %1924 = vmatpush.bf16.msra.mxu3 %v2201_v57  ;;  %v2324_v57 = vmov -1.0  }
 0x4eb   : > { %2282 = vrcp.f32 %v1594_v53  ;;  %v2867_v39 = vmul.f32 0.70710677, %v2864_v37  ;;  %v1613_v52 = vand.u32 2147483648, %v1594_v53  ;;  %v1611_v63 = vand.u32 2147483647, %v1594_v53 }
 0x4ec   : > { %vm1607_vm9 = vweird.f32 %v1594_v53  ;;  %v1810_v48 = vmul.f32 1.442695, %v1802_v9 }
 0x4ed   : > { %v2870_v40 = vand.u32 2147483647, %v2867_v39  ;;  %v1614_v43 = vor.u32 1.1754944e-38, %v1613_v52  ;;  %vm1612_vm12 = vcmp.eq.f32.partialorder %v1611_v63, 8.507059e+37 }
 0x4ef   : > { %v1587_v42 = vmul.f32 0.3275911, %v2870_v40  ;;  %v1795_v50 = vsub.f32 0.0, %v2870_v40 }
 0x4f0   : > { %v1531_v38 = vpop.f32.mrf.mxu2 }
 0x4f1   : > { %v2283_v44 = vpop.eup %2282  ;;  %v2874_v13 = vadd.f32 %v2854_v21, %v1531_v38  ;;  %v1595_v35 = vadd.f32 1.0, %v1587_v42  ;;  %v1803_v63 = vmul.f32 %v1795_v50, %v2870_v40 }
 0x4f2   : > { %v1603_v58 = vmul.f32 %v2283_v44, %v1594_v53  ;;  %vm1608_vm8 = vweird.f32 %v2283_v44 }
 0x4f3   : > { %v2877_v51 = vmul.f32 0.70710677, %v2874_v13  ;;  %2284 = vrcp.f32 %v1595_v35  ;;  %vm1609_vm10 = vmor %vm1607_vm9, %vm1608_vm8  ;;  %v1628_v47 = vand.u32 2147483648, %v1595_v35  ;;  %v1626_v18 = vand.u32 2147483647, %v1595_v35 }
 0x4f4   : > { %v1604_v10 = vsub.f32 1.0, %v1603_v58  ;;  %vm1622_vm14 = vweird.f32 %v1595_v35  ;;  %vm1563_vm8 = vcmp.ge.f32.partialorder %v2867_v39, 0.0 }
 0x4f5   : > { %v2880_v54 = vand.u32 2147483647, %v2877_v51  ;;  %v1629_v31 = vor.u32 1.1754944e-38, %v1628_v47  ;;  %vm1627_vm0 = vcmp.eq.f32.partialorder %v1626_v18, 8.507059e+37 }
 0x4f6   : > { %v1605_v55 = vmul.f32 %v2283_v44, %v1604_v10 }
 0x4f7   : > { %v1588_v56 = vmul.f32 0.3275911, %v2880_v54  ;;  %v1796_v28 = vsub.f32 0.0, %v2880_v54 }
 0x4f8   : > { %v1606_v15 = vadd.f32 %v2283_v44, %v1605_v55  ;;  %v1533_v59 = vpop.f32.mrf.mxu2 }
 0x4f9   : > { %v2883_v32 = vadd.f32 1.0, %v1588_v56  ;;  %v2886_v0 = vadd.f32 %v2854_v21, %v1533_v59  ;;  %v2285_v61 = vpop.eup %2284 }
 0x4fa   : > { %v1610_v4 = vsel %vm1609_vm10, %v2283_v44, %v1606_v15  ;;  %v1618_v8 = vmul.f32 %v2285_v61, %v1595_v35  ;;  %vm1623_vm13 = vweird.f32 %v2285_v61 }
 0x4fb   : > { %v2888_v7 = vsel %vm1612_vm12, %v1614_v43, %v1610_v4  ;;  %2286 = vrcp.f32 %v2883_v32  ;;  %v2896_v14 = vmul.f32 0.70710677, %v2886_v0  ;;  %vm1624_vm15 = vmor %vm1622_vm14, %vm1623_vm13  ;;  %v1643_v58 = vand.u32 2147483648, %v2883_v32  ;;  %v2200_v43 = vld [vmem:[%s3076_s15] sm:$0xff] }
 0x4fc   : > { %v1722_v33 = vmul.f32 1.0614054, %v2888_v7  ;;  %v1619_v19 = vsub.f32 1.0, %v1618_v8  ;;  %v1641_v52 = vand.u32 2147483647, %v2883_v32  ;;  %vm1637_vm3 = vweird.f32 %v2883_v32  ;;  %1925 = vmatpush.bf16.msra.mxu3 %v2200_v43 }
 0x4fd   : > { %v2899_v12 = vand.u32 2147483647, %v2896_v14  ;;  %v1644_v4 = vor.u32 1.1754944e-38, %v1643_v58 }
 0x4fe   : > { %v1730_v5 = vadd.f32 -1.4531521, %v1722_v33  ;;  %v1620_v6 = vmul.f32 %v2285_v61, %v1619_v19  ;;  %vm1642_vm5 = vcmp.eq.f32.partialorder %v1641_v52, 8.507059e+37 }
 0x4ff   : > { %v1589_v30 = vmul.f32 0.3275911, %v2899_v12 }
 0x500   : > { %v1738_v22 = vmul.f32 %v1730_v5, %v2888_v7  ;;  %v1536_v17 = vpop.f32.mrf.mxu2  ;;  %v1621_v24 = vadd.f32 %v2285_v61, %v1620_v6 }
 0x501   : > { %v2287_v23 = vpop.eup %2286  ;;  %v2907_v29 = vadd.f32 %v2854_v21, %v1536_v17  ;;  %v2911_v41 = vadd.f32 1.0, %v1589_v30 }
 0x502   : > { %v1746_v3 = vadd.f32 1.4214138, %v1738_v22  ;;  %v1633_v1 = vmul.f32 %v2287_v23, %v2883_v32  ;;  %v1625_v27 = vsel %vm1624_vm15, %v2285_v61, %v1621_v24  ;;  %vm1638_vm2 = vweird.f32 %v2287_v23 }
 0x503   : > { %v2917_v53 = vsel %vm1627_vm0, %v1629_v31, %v1625_v27  ;;  %v2920_v38 = vmul.f32 0.70710677, %v2907_v29  ;;  %2288 = vrcp.f32 %v2911_v41  ;;  %vm1639_vm4 = vmor %vm1637_vm3, %vm1638_vm2  ;;  %v1812_v32 = vmul.f32 1.442695, %v1803_v63 }
 0x504   : > { %v1754_v36 = vmul.f32 %v1746_v3, %v2888_v7  ;;  %v1634_v42 = vsub.f32 1.0, %v1633_v1  ;;  %v1723_v44 = vmul.f32 1.0614054, %v2917_v53  ;;  %2290 = vpow2.f32 %v1810_v48 }
 0x505   : > { %v2928_v56 = vand.u32 2147483647, %v2920_v38  ;;  %v2946_v22 = vmul.f32 0.5, %v2857_v34  ;;  %v1658_v34 = vand.u32 2147483648, %v2911_v41  ;;  %v1656_v50 = vand.u32 2147483647, %v2911_v41 }
 0x506   : > { %v1762_v35 = vadd.f32 -0.28449672, %v1754_v36  ;;  %v1635_v10 = vmul.f32 %v2287_v23, %v1634_v42  ;;  %v1731_v55 = vadd.f32 -1.4531521, %v1723_v44  ;;  %v1570_v36 = vsel %vm1562_vm6, 1.0, %v2324_v57 }
 0x507   : > { %v1590_v2 = vmul.f32 0.3275911, %v2928_v56  ;;  %vm1652_vm9 = vweird.f32 %v2911_v41  ;;  %vm1657_vm12 = vcmp.eq.f32.partialorder %v1656_v50, 8.507059e+37  ;;  %vm1564_vm2 = vcmp.ge.f32.partialorder %v2877_v51, 0.0 }
 0x508   : > { %v1770_v15 = vmul.f32 %v1762_v35, %v2888_v7  ;;  %v1636_v59 = vadd.f32 %v2287_v23, %v1635_v10  ;;  %v1739_v61 = vmul.f32 %v1731_v55, %v2917_v53  ;;  %v1538_v33 = vpop.f32.mrf.mxu2  ;;  %v1659_v55 = vor.u32 1.1754944e-38, %v1658_v34 }
 0x509   : > { %v2289_v19 = vpop.eup %2288  ;;  %v2940_v47 = vadd.f32 1.0, %v1590_v2 }
 0x50a   : > { %v1778_v40 = vadd.f32 0.2548296, %v1770_v15  ;;  %v1640_v8 = vsel %vm1639_vm4, %v2287_v23, %v1636_v59  ;;  %v1747_v5 = vadd.f32 1.4214138, %v1739_v61  ;;  %v1648_v20 = vmul.f32 %v2289_v19, %v2911_v41  ;;  %v2291_v24 = vpop.eup %2290 }
 0x50b   : > { %v2938_v9 = vsel %vm1642_vm5, %v1644_v4, %v1640_v8  ;;  %2292 = vrcp.f32 %v2940_v47  ;;  %v2951_v23 = vadd.f32 %v2854_v21, %v1538_v33  ;;  %vm1653_vm7 = vweird.f32 %v2289_v19 }
 0x50c   : > { %v1786_v6 = vmul.f32 %v1778_v40, %v2888_v7  ;;  %v1724_v18 = vmul.f32 1.0614054, %v2938_v9  ;;  %v1755_v17 = vmul.f32 %v1747_v5, %v2917_v53  ;;  %v1804_v7 = vmul.f32 %v1796_v28, %v2880_v54  ;;  %vm1654_vm10 = vmor %vm1652_vm9, %vm1653_vm7 }
 0x50d   : > { %v1649_v3 = vsub.f32 1.0, %v1648_v20  ;;  %2294 = vpow2.f32 %v1812_v32  ;;  %v2962_v54 = vmul.f32 0.70710677, %v2951_v23  ;;  %v1797_v41 = vsub.f32 0.0, %v2899_v12 }
 0x50e   : > { %v1732_v30 = vadd.f32 -1.4531521, %v1724_v18  ;;  %v1826_v48 = vmul.f32 %v2291_v24, %v1786_v6  ;;  %v1763_v31 = vadd.f32 -0.28449672, %v1755_v17  ;;  %v1814_v44 = vmul.f32 1.442695, %v1804_v7 }
 0x50f   : > { %v1650_v27 = vmul.f32 %v2289_v19, %v1649_v3  ;;  %v2966_v63 = vand.u32 2147483647, %v2962_v54  ;;  %v1671_v40 = vand.u32 2147483647, %v2940_v47  ;;  %v1571_v8 = vsel %vm1563_vm8, 1.0, %v2324_v57 }
 0x510   : > { %v1740_v1 = vmul.f32 %v1732_v30, %v2938_v9  ;;  %v1771_v26 = vmul.f32 %v1763_v31, %v2917_v53  ;;  %v1834_v10 = vsub.f32 1.0, %v1826_v48  ;;  %v1673_v6 = vand.u32 2147483648, %v2940_v47 }
 0x511   : > { %v1651_v58 = vadd.f32 %v2289_v19, %v1650_v27  ;;  %v2293_v35 = vpop.eup %2292  ;;  %v1591_v18 = vmul.f32 0.3275911, %v2966_v63  ;;  %2296 = vpow2.f32 %v1814_v44  ;;  %v1805_v30 = vmul.f32 %v1797_v41, %v2899_v12 }
 0x512   : > { %v1748_v42 = vadd.f32 1.4214138, %v1740_v1  ;;  %v1779_v52 = vadd.f32 0.2548296, %v1771_v26  ;;  %v1663_v43 = vmul.f32 %v2293_v35, %v2940_v47  ;;  %v1842_v32 = vmul.f32 %v1834_v10, %v1570_v36 }
 0x513   : > { %v1655_v59 = vsel %vm1654_vm10, %v2289_v19, %v1651_v58  ;;  %v2295_v61 = vpop.eup %2294  ;;  %vm1668_vm13 = vweird.f32 %v2293_v35  ;;  %v1599_v39 = vadd.f32 1.0, %v1591_v18  ;;  %vm1667_vm14 = vweird.f32 %v2940_v47 }
 0x514   : > { %v1756_v15 = vmul.f32 %v1748_v42, %v2938_v9  ;;  %v1787_v4 = vmul.f32 %v1779_v52, %v2917_v53  ;;  %v1660_v2 = vsel %vm1657_vm12, %v1659_v55, %v1655_v59  ;;  %v1664_v5 = vsub.f32 1.0, %v1663_v43  ;;  %vm1669_vm15 = vmor %vm1667_vm14, %vm1668_vm13 }
 0x515   : > { %v1725_v33 = vmul.f32 1.0614054, %v1660_v2  ;;  %v1850_v31 = vadd.f32 1.0, %v1842_v32  ;;  %v1674_v1 = vor.u32 1.1754944e-38, %v1673_v6  ;;  %2298 = vrcp.f32 %v1599_v39 }
 0x516   : > { %v1764_v28 = vadd.f32 -0.28449672, %v1756_v15  ;;  %v1827_v19 = vmul.f32 %v2295_v61, %v1787_v4  ;;  %v1665_v17 = vmul.f32 %v2293_v35, %v1664_v5  ;;  %vm1672_vm0 = vcmp.eq.f32.partialorder %v1671_v40, 8.507059e+37 }
 0x517   : > { %v1733_v20 = vadd.f32 -1.4531521, %v1725_v33  ;;  %v1547_v26 = vmul.f32 0.5, %v2864_v37  ;;  %v1816_v12 = vmul.f32 1.442695, %v1805_v30  ;;  %v2297_v52 = vpop.eup %2296  ;;  %v1858_v47 = vmul.f32 %v1850_v31, %v2946_v22 }
 0x518   : > { %v1772_v53 = vmul.f32 %v1764_v28, %v2938_v9  ;;  %v1835_v24 = vsub.f32 1.0, %v1827_v19  ;;  %v1666_v48 = vadd.f32 %v2293_v35, %v1665_v17  ;;  %v1798_v37 = vsub.f32 0.0, %v2928_v56 }
 0x519   : > { %v1741_v3 = vmul.f32 %v1733_v20, %v1660_v2  ;;  %2300 = vpow2.f32 %v1816_v12  ;;  %v1686_v33 = vand.u32 2147483647, %v1599_v39  ;;  %v1688_v5 = vand.u32 2147483648, %v1599_v39 }
 0x51a   : > { %v1780_v7 = vadd.f32 0.2548296, %v1772_v53  ;;  %v1843_v34 = vmul.f32 %v1835_v24, %v1571_v8  ;;  %v1670_v36 = vsel %vm1669_vm15, %v2293_v35, %v1666_v48  ;;  %v1572_v53 = vsel %vm1564_vm2, 1.0, %v2324_v57 }
 0x51b   : > { %v1749_v50 = vadd.f32 1.4214138, %v1741_v3  ;;  %v1675_v44 = vsel %vm1672_vm0, %v1674_v1, %v1670_v36  ;;  %v2299_v61 = vpop.eup %2298  ;;  %vm1565_vm4 = vcmp.ge.f32.partialorder %v2896_v14, 0.0  ;;  %v1806_v51 = vmul.f32 %v1798_v37, %v2928_v56 }
 0x51c   : > { %v1788_v27 = vmul.f32 %v1780_v7, %v2938_v9  ;;  %v1851_v42 = vadd.f32 1.0, %v1843_v34  ;;  %v1726_v10 = vmul.f32 1.0614054, %v1675_v44  ;;  %v1678_v41 = vmul.f32 %v2299_v61, %v1599_v39 }
 0x51d   : > { %v1757_v58 = vmul.f32 %v1749_v50, %v1660_v2  ;;  %vm1683_vm3 = vweird.f32 %v2299_v61  ;;  %vm1682_vm5 = vweird.f32 %v1599_v39  ;;  %v1689_v7 = vor.u32 1.1754944e-38, %v1688_v5 }
 0x51e   : > { %v1859_v55 = vmul.f32 %v1851_v42, %v1547_v26  ;;  %v1828_v15 = vmul.f32 %v2297_v52, %v1788_v27  ;;  %v1734_v43 = vadd.f32 -1.4531521, %v1726_v10  ;;  %v1679_v22 = vsub.f32 1.0, %v1678_v41  ;;  %vm1684_vm6 = vmor %vm1682_vm5, %vm1683_vm3 }
 0x51f   : > { %v1765_v59 = vadd.f32 -0.28449672, %v1757_v58  ;;  %v2301_v18 = vpop.eup %2300  ;;  %vm1687_vm7 = vcmp.eq.f32.partialorder %v1686_v33, 8.507059e+37  ;;  %v1573_v31 = vsel %vm1565_vm4, 1.0, %v2324_v57  ;;  %v1818_v34 = vmul.f32 1.442695, %v1806_v51 }
 0x520   : > { %v1866_v4 = vpack.c.bf16 %v1859_v55, %v1858_v47  ;;  %v1742_v35 = vmul.f32 %v1734_v43, %v1675_v44  ;;  %v1836_v40 = vsub.f32 1.0, %v1828_v15  ;;  %v1680_v6 = vmul.f32 %v2299_v61, %v1679_v22 }
 0x521   : > { %v1773_v9 = vmul.f32 %v1765_v59, %v1660_v2  ;;  %v1799_v27 = vsub.f32 0.0, %v2966_v63  ;;  %v1548_v39 = vmul.f32 0.5, %v2874_v13  ;;  %v1549_v36 = vmul.f32 0.5, %v2886_v0 }
 0x522   : > { %2177 = vmatmul.msk.bf16.vlgmr.msra.gmra.mxu3 %vm868_vm1, %v1866_v4  ;;  %v1750_v28 = vadd.f32 1.4214138, %v1742_v35  ;;  %v1844_v20 = vmul.f32 %v1836_v40, %v1572_v53  ;;  %v1681_v30 = vadd.f32 %v2299_v61, %v1680_v6  ;;  %2302 = vpow2.f32 %v1818_v34 }
 0x523   : > { %v1781_v8 = vadd.f32 0.2548296, %v1773_v9  ;;  %v1807_v58 = vmul.f32 %v1799_v27, %v2966_v63  ;;  %vm1566_vm8 = vcmp.ge.f32.partialorder %v2920_v38, 0.0  ;;  %vm1567_vm9 = vcmp.ge.f32.partialorder %v2962_v54, 0.0 }
 0x524   : > { %v1758_v19 = vmul.f32 %v1750_v28, %v1675_v44  ;;  %v1852_v14 = vadd.f32 1.0, %v1844_v20  ;;  %v1574_v40 = vsel %vm1566_vm8, 1.0, %v2324_v57  ;;  %v1575_v22 = vsel %vm1567_vm9, 1.0, %v2324_v57 }
 0x525   : > { %v1789_v32 = vmul.f32 %v1781_v8, %v1660_v2  ;;  %v1685_v2 = vsel %vm1684_vm6, %v2299_v61, %v1681_v30  ;;  %v1820_v43 = vmul.f32 1.442695, %v1807_v58 }
 0x526   : > { %v1766_v24 = vadd.f32 -0.28449672, %v1758_v19  ;;  %v1690_v1 = vsel %vm1687_vm7, %v1689_v7, %v1685_v2  ;;  %v1860_v10 = vmul.f32 %v1852_v14, %v1548_v39  ;;  %v1551_v19 = vmul.f32 0.5, %v2951_v23 }
 0x527   : > { %v1829_v17 = vmul.f32 %v2301_v18, %v1789_v32  ;;  %v1727_v56 = vmul.f32 1.0614054, %v1690_v1  ;;  %2304 = vpow2.f32 %v1820_v43  ;;  %v1550_v32 = vmul.f32 0.5, %v2907_v29 }
 0x528   : > { %v1774_v48 = vmul.f32 %v1766_v24, %v1675_v44  ;;  %v2303_v4 = vpop.eup %2302 }
 0x529   : > { %v1837_v3 = vsub.f32 1.0, %v1829_v17  ;;  %v1735_v12 = vadd.f32 -1.4531521, %v1727_v56 }
 0x52a   : > { %v1782_v42 = vadd.f32 0.2548296, %v1774_v48 }
 0x52b   : > { %v1845_v50 = vmul.f32 %v1837_v3, %v1573_v31  ;;  %v1743_v47 = vmul.f32 %v1735_v12, %v1690_v1 }
 0x52c   : > { %v1790_v55 = vmul.f32 %v1782_v42, %v1675_v44 }
 0x52d   : > { %v1853_v26 = vadd.f32 1.0, %v1845_v50  ;;  %v1751_v15 = vadd.f32 1.4214138, %v1743_v47  ;;  %v2305_v37 = vpop.eup %2304 }
 0x52e   : > { %v1830_v13 = vmul.f32 %v2303_v4, %v1790_v55 }
 0x52f   : > { %v1861_v52 = vmul.f32 %v1853_v26, %v1549_v36  ;;  %v1759_v61 = vmul.f32 %v1751_v15, %v1690_v1 }
 0x530   : > { %v1838_v35 = vsub.f32 1.0, %v1830_v13 }
 0x531   : > { %v1867_v59 = vpack.c.bf16 %v1861_v52, %v1860_v10  ;;  %v1767_v9 = vadd.f32 -0.28449672, %v1759_v61 }
 0x532   : > { %v1846_v44 = vmul.f32 %v1838_v35, %v1574_v40 }
 0x533   : > { %2178 = vmatmul.msk.bf16.gmra.mxu3 %vm868_vm1, %v1867_v59  ;;  %v1775_v0 = vmul.f32 %v1767_v9, %v1690_v1 }
 0x534   : > { %v1854_v33 = vadd.f32 1.0, %v1846_v44 }
 0x535   : > { %v1783_v41 = vadd.f32 0.2548296, %v1775_v0 }
 0x536   : > { %v1862_v6 = vmul.f32 %v1854_v33, %v1550_v32 }
 0x537   : > { %v1791_v63 = vmul.f32 %v1783_v41, %v1690_v1 }
 0x539   : > { %v1831_v8 = vmul.f32 %v2305_v37, %v1791_v63 }
 0x53b   : > { %v1839_v28 = vsub.f32 1.0, %v1831_v8 }
 0x53d   : > { %v1847_v5 = vmul.f32 %v1839_v28, %v1575_v22 }
 0x53f   : > { %v1855_v38 = vadd.f32 1.0, %v1847_v5 }
 0x541   : > { %v1863_v18 = vmul.f32 %v1855_v38, %v1551_v19 }
 0x543   : > { %v1868_v53 = vpack.c.bf16 %v1863_v18, %v1862_v6 }
 0x545   : > { %2179 = vmatmul.msk.bf16.gmra.mxu3 %vm868_vm1, %v1868_v53 }
 0x55b   : > { %v1541_v51 = vpop.f32.mrf.mxu2 }
 0x55c   : > { %v3004_v20 = vadd.f32 %v2854_v21, %v1541_v51 }
 0x55e   : > { %v3007_v54 = vmul.f32 0.70710677, %v3004_v20 }
 0x560   : > { %v1584_v17 = vand.u32 2147483647, %v3007_v54  ;;  %vm1568_vm4 = vcmp.ge.f32.partialorder %v3007_v54, 0.0 }
 0x562   : > { %v1592_v24 = vmul.f32 0.3275911, %v1584_v17  ;;  %v1800_v58 = vsub.f32 0.0, %v1584_v17 }
 0x563   : > { %v1543_v30 = vpop.f32.mrf.mxu2 }
 0x564   : > { %v1600_v29 = vadd.f32 1.0, %v1592_v24  ;;  %v3011_v23 = vadd.f32 %v2854_v21, %v1543_v30  ;;  %v1808_v43 = vmul.f32 %v1800_v58, %v1584_v17 }
 0x566   : > { %2306 = vrcp.f32 %v1600_v29  ;;  %v3014_v7 = vmul.f32 0.70710677, %v3011_v23  ;;  %v1703_v27 = vand.u32 2147483648, %v1600_v29  ;;  %v1701_v50 = vand.u32 2147483647, %v1600_v29 }
 0x567   : > { %vm1697_vm12 = vweird.f32 %v1600_v29  ;;  %v1822_v35 = vmul.f32 1.442695, %v1808_v43 }
 0x568   : > { %v1585_v3 = vand.u32 2147483647, %v3014_v7  ;;  %v1704_v21 = vor.u32 1.1754944e-38, %v1703_v27  ;;  %vm1702_vm14 = vcmp.eq.f32.partialorder %v1701_v50, 8.507059e+37  ;;  %vm1569_vm5 = vcmp.ge.f32.partialorder %v3014_v7, 0.0 }
 0x569   : > { %v1553_v50 = vmul.f32 0.5, %v3011_v23 }
 0x56a   : > { %v1593_v48 = vmul.f32 0.3275911, %v1585_v3  ;;  %v1801_v63 = vsub.f32 0.0, %v1585_v3 }
 0x56c   : > { %v2307_v2 = vpop.eup %2306  ;;  %v1601_v34 = vadd.f32 1.0, %v1593_v48  ;;  %v1809_v28 = vmul.f32 %v1801_v63, %v1585_v3  ;;  %v1576_v48 = vsel %vm1568_vm4, 1.0, %v2324_v57 }
 0x56d   : > { %v1693_v31 = vmul.f32 %v2307_v2, %v1600_v29  ;;  %vm1698_vm10 = vweird.f32 %v2307_v2 }
 0x56e   : > { %2308 = vrcp.f32 %v1601_v34  ;;  %vm1699_vm13 = vmor %vm1697_vm12, %vm1698_vm10  ;;  %v1718_v47 = vand.u32 2147483648, %v1601_v34  ;;  %v1716_v15 = vand.u32 2147483647, %v1601_v34  ;;  %vm1712_vm0 = vweird.f32 %v1601_v34 }
 0x56f   : > { %v1694_v1 = vsub.f32 1.0, %v1693_v31  ;;  %2310 = vpow2.f32 %v1822_v35  ;;  %v1824_v19 = vmul.f32 1.442695, %v1809_v28  ;;  %v2204_v31 = vld [vmem:[%s3078_s17] sm:$0xff] }
 0x570   : > { %v1719_v13 = vor.u32 1.1754944e-38, %v1718_v47  ;;  %vm1717_vm3 = vcmp.eq.f32.partialorder %v1716_v15, 8.507059e+37  ;;  %1990 = vmatpush.bf16.msra.mxu0 %v2204_v31 }
 0x571   : > { %v1695_v14 = vmul.f32 %v2307_v2, %v1694_v1  ;;  %2312 = vpow2.f32 %v1824_v19  ;;  %v1577_v1 = vsel %vm1569_vm5, 1.0, %v2324_v57 }
 0x573   : > { %v1696_v56 = vadd.f32 %v2307_v2, %v1695_v14  ;;  %v1552_v14 = vmul.f32 0.5, %v3004_v20 }
 0x574   : > { %v2309_v39 = vpop.eup %2308 }
 0x575   : > { %v1700_v36 = vsel %vm1699_vm13, %v2307_v2, %v1696_v56  ;;  %v1708_v42 = vmul.f32 %v2309_v39, %v1601_v34  ;;  %vm1713_vm15 = vweird.f32 %v2309_v39  ;;  %v2311_v6 = vpop.eup %2310 }
 0x576   : > { %v1705_v26 = vsel %vm1702_vm14, %v1704_v21, %v1700_v36  ;;  %vm1714_vm2 = vmor %vm1712_vm0, %vm1713_vm15 }
 0x577   : > { %v1728_v12 = vmul.f32 1.0614054, %v1705_v26  ;;  %v1709_v10 = vsub.f32 1.0, %v1708_v42  ;;  %v2313_v29 = vpop.eup %2312 }
 0x579   : > { %v1736_v52 = vadd.f32 -1.4531521, %v1728_v12  ;;  %v1710_v55 = vmul.f32 %v2309_v39, %v1709_v10 }
 0x57b   : > { %v1744_v59 = vmul.f32 %v1736_v52, %v1705_v26  ;;  %v1711_v61 = vadd.f32 %v2309_v39, %v1710_v55 }
 0x57d   : > { %v1752_v4 = vadd.f32 1.4214138, %v1744_v59  ;;  %v1715_v9 = vsel %vm1714_vm2, %v2309_v39, %v1711_v61 }
 0x57e   : > { %v1720_v41 = vsel %vm1717_vm3, %v1719_v13, %v1715_v9 }
 0x57f   : > { %v1760_v0 = vmul.f32 %v1752_v4, %v1705_v26  ;;  %v1729_v37 = vmul.f32 1.0614054, %v1720_v41 }
 0x581   : > { %v1768_v40 = vadd.f32 -0.28449672, %v1760_v0  ;;  %v1737_v44 = vadd.f32 -1.4531521, %v1729_v37 }
 0x583   : > { %v1776_v8 = vmul.f32 %v1768_v40, %v1705_v26  ;;  %v1745_v22 = vmul.f32 %v1737_v44, %v1720_v41  ;;  %v2231_v44 = vld [vmem:[%s3079_s18] ss:$0 sm:$0xff] }
 0x585   : > { %v1784_v33 = vadd.f32 0.2548296, %v1776_v8  ;;  %v1753_v5 = vadd.f32 1.4214138, %v1745_v22 }
 0x587   : > { %v1792_v32 = vmul.f32 %v1784_v33, %v1705_v26  ;;  %v1761_v38 = vmul.f32 %v1753_v5, %v1720_v41  ;;  %v2230_v26 = vld [vmem:[%s3077_s16] ss:$0 sm:$0xff] }
 0x589   : > { %v1832_v18 = vmul.f32 %v2311_v6, %v1792_v32  ;;  %v1769_v53 = vadd.f32 -0.28449672, %v1761_v38 }
 0x58b   : > { %v1777_v51 = vmul.f32 %v1769_v53, %v1720_v41  ;;  %v1840_v17 = vsub.f32 1.0, %v1832_v18 }
 0x58d   : > { %v1785_v24 = vadd.f32 0.2548296, %v1777_v51  ;;  %v1848_v3 = vmul.f32 %v1840_v17, %v1576_v48 }
 0x58f   : > { %v1793_v30 = vmul.f32 %v1785_v24, %v1720_v41  ;;  %v1856_v27 = vadd.f32 1.0, %v1848_v3 }
 0x591   : > { %v1833_v2 = vmul.f32 %v2313_v29, %v1793_v30  ;;  %v1864_v21 = vmul.f32 %v1856_v27, %v1552_v14 }
 0x593   : > { %v1841_v34 = vsub.f32 1.0, %v1833_v2 }
 0x595   : > { %v1849_v54 = vmul.f32 %v1841_v34, %v1577_v1 }
 0x597   : > { %v1857_v56 = vadd.f32 1.0, %v1849_v54 }
 0x599   : > { %v1865_v39 = vmul.f32 %v1857_v56, %v1553_v50 }
 0x59b   : > { %v1869_v36 = vpack.c.bf16 %v1865_v39, %v1864_v21 }
 0x59d   : > { %2180 = vmatmul.msk.bf16.gmra.mxu3 %vm868_vm1, %v1869_v36 }
 0x5a5   : > { %v1927_v7 = vpop.f32.mrf.mxu3 }
 0x5a6   : > { %v1928_v42 = vadd.f32 %v2230_v26, %v1927_v7 }
 0x5a8   : > { %v1947_v58 = vadd.f32 %v1928_v42, %v2795_v45 }
 0x5ad   : > { %v1929_v57 = vpop.f32.mrf.mxu3 }
 0x5ae   : > { %v1930_v12 = vadd.f32 %v2230_v26, %v1929_v57 }
 0x5b0   : > { %v1948_v20 = vadd.f32 %v1930_v12, %v2798_v16 }
 0x5b2   : > { %v1955_v10 = vpack.c.bf16 %v1948_v20, %v1947_v58 }
 0x5b4   : > { %2185 = vmatmul.msk.bf16.vlgmr.msra.gmra.mxu0 %vm1275_vm11, %v1955_v10 }
 0x5b6   : > { %v1932_v23 = vpop.f32.mrf.mxu3 }
 0x5b7   : > { %v1933_v52 = vadd.f32 %v2230_v26, %v1932_v23 }
 0x5b9   : > { %v1949_v15 = vadd.f32 %v1933_v52, %v2811_v46 }
 0x5be   : > { %v1934_v47 = vpop.f32.mrf.mxu3 }
 0x5bf   : > { %v1935_v55 = vadd.f32 %v2230_v26, %v1934_v47 }
 0x5c1   : > { %v1950_v59 = vadd.f32 %v1935_v55, %v2814_v49 }
 0x5c3   : > { %v1956_v43 = vpack.c.bf16 %v1950_v59, %v1949_v15 }
 0x5c5   : > { %2186 = vmatmul.msk.bf16.gmra.mxu0 %vm1275_vm11, %v1956_v43 }
 0x5c8   : > { %v1937_v61 = vpop.f32.mrf.mxu3 }
 0x5c9   : > { %v1938_v4 = vadd.f32 %v2230_v26, %v1937_v61 }
 0x5cb   : > { %v1951_v16 = vadd.f32 %v1938_v4, %v2826_v60 }
 0x5d0   : > { %v1939_v45 = vpop.f32.mrf.mxu3 }
 0x5d1   : > { %v1940_v13 = vadd.f32 %v2230_v26, %v1939_v45 }
 0x5d3   : > { %v1952_v9 = vadd.f32 %v1940_v13, %v2829_v62 }
 0x5d5   : > { %v1957_v0 = vpack.c.bf16 %v1952_v9, %v1951_v16 }
 0x5d7   : > { %2187 = vmatmul.msk.bf16.gmra.mxu0 %vm1275_vm11, %v1957_v0 }
 0x620   : > { %v1942_v35 = vpop.f32.mrf.mxu3 }
 0x621   : > { %v1943_v41 = vadd.f32 %v2230_v26, %v1942_v35 }
 0x623   : > { %v1953_v49 = vadd.f32 %v1943_v41, %v2843_v25 }
 0x628   : > { %v1944_v46 = vpop.f32.mrf.mxu3 }
 0x629   : > { %v1945_v63 = vadd.f32 %v2230_v26, %v1944_v46 }
 0x62b   : > { %v1954_v37 = vadd.f32 %v1945_v63, %v2846_v11 }
 0x62d   : > { %v1958_v40 = vpack.c.bf16 %v1954_v37, %v1953_v49 }
 0x62f   : > { %2188 = vmatmul.msk.bf16.gmra.mxu0 %vm1275_vm11, %v1958_v40 }
 0x631   : > { %v1992_v60 = vpop.f32.mrf.mxu0 }
 0x632   : > { %v1993_v62 = vadd.f32 %v2231_v44, %v1992_v60 }
 0x634   : > { %2012 = vst.msk [vmem:[%s604_s28] sm:$0xff] %vm1275_vm11, %v1993_v62 }
 0x639   : > { %v1994_v8 = vpop.f32.mrf.mxu0 }
 0x63a   : > { %v1995_v25 = vadd.f32 %v2231_v44, %v1994_v8 }
 0x63c   : > { %2013 = vst.msk [vmem:[%s604_s28 + $0x8] sm:$0xff] %vm1275_vm11, %v1995_v25 }
 0x642   : > { %v1997_v11 = vpop.f32.mrf.mxu0 }
 0x643   : > { %v1998_v28 = vadd.f32 %v2231_v44, %v1997_v11 }
 0x645   : > { %2014 = vst.msk [vmem:[%s604_s28 + $0x10] sm:$0xff] %vm1275_vm11, %v1998_v28 }
 0x64a   : > { %v1999_v22 = vpop.f32.mrf.mxu0 }
 0x64b   : > { %v2000_v33 = vadd.f32 %v2231_v44, %v1999_v22 }
 0x64d   : > { %2015 = vst.msk [vmem:[%s604_s28 + $0x18] sm:$0xff] %vm1275_vm11, %v2000_v33 }
 0x654   : > { %v2002_v5 = vpop.f32.mrf.mxu0 }
 0x655   : > { %v2003_v32 = vadd.f32 %v2231_v44, %v2002_v5 }
 0x657   : > { %2016 = vst.msk [vmem:[%s604_s28 + $0x20] sm:$0xff] %vm1275_vm11, %v2003_v32 }
 0x65c   : > { %v2004_v19 = vpop.f32.mrf.mxu0 }
 0x65d   : > { %v2005_v38 = vadd.f32 %v2231_v44, %v2004_v19 }
 0x65f   : > { %2017 = vst.msk [vmem:[%s604_s28 + $0x28] sm:$0xff] %vm1275_vm11, %v2005_v38 }
 0x6ac   : > { %v2007_v6 = vpop.f32.mrf.mxu0 }
 0x6ad   : > { %v2008_v18 = vadd.f32 %v2231_v44, %v2007_v6 }
 0x6af   : > { %2018 = vst.msk [vmem:[%s604_s28 + $0x30] sm:$0xff] %vm1275_vm11, %v2008_v18 }
 0x6b4   : > { %v2009_v53 = vpop.f32.mrf.mxu0 }
 0x6b5   : > { %v2010_v51 = vadd.f32 %v2231_v44, %v2009_v53 }
 0x6b7   : > { %2019 = vst.msk [vmem:[%s604_s28 + $0x38] sm:$0xff] %vm1275_vm11, %v2010_v51 }
 0x6b8 PF: > { %s29_s0 = sadd.s32 1, %s2320_s0  }
 0x6b9   : > { %p26_p4 = scmp.ge.s32.totalorder %s29_s0, 4  }
 0x6bb   :  { %28 = sbr.rel (!%p26_p4) target bundleno = 5 (0x5), region = 126 }

</bundles_post_ra>
